<compile_context>
chip_gen: v7x
topology: tpu7x:2x2x1
jax: 0.10.0
libtpu: 0.0.40
codegen_flags: <defaults>
</compile_context>

<pallas_src>
import jax
import jax.numpy as jnp
import numpy as np
from jax import lax
from jax.experimental import pallas as pl
from jax.experimental.pallas import tpu as pltpu


def _cdiv(a, b):
    return -(-a // b)


# ----------------------------------- kernel ---------------------------------------

def _repdw_kernel(x_ref, w_ref, b_ref, o_ref):
    """One (batch, channel-group-tile) block.

    x_ref: (1, H+4, TCg, L)  packed input.  L = G*S lanes: G channels side by side, each
                             in its own S-wide segment with a 2-px halo (S >= W+4).
    w_ref: (25, TCg, L)      BN-folded 5x5 taps (3x3 folded in), pre-broadcast to lanes.
    b_ref: (TCg, L)          combined bias, pre-broadcast to lanes.
    o_ref: (1, H, TCg, L)    output; only lanes [g*S, g*S + W) of each segment are valid.
    """
    _, H, _, L = o_ref.shape
    x = x_ref[...]                       # (1, H+4, TCg, L)
    w = w_ref[...]                       # (25, TCg, L) -- hoisted once out of the tap loop

    acc = None
    for dx in range(5):
        # Horizontal shift on the XLU: result lane j holds input lane j+dx.  The wrap at
        # the end of the lane dim only lands in discarded (>= W) segment lanes.
        xs = x if dx == 0 else pltpu.roll(x, shift=L - dx, axis=3)
        for dy in range(5):
            # Vertical shift: slice along the untiled major H dim (address offset only).
            t = xs[:, dy:dy + H] * w[5 * dy + dx]
            acc = t if acc is None else acc + t

    y = acc + b_ref[...]
    # SiLU = y / (1 + exp(-y)).  approx=True would move the divide onto the EUP at ~2e-4
    # relative error; exact reciprocal kept so the 1e-4 reference check holds.
    o_ref[...] = (y * pl.reciprocal(1.0 + jnp.exp(-y), approx=False)).astype(o_ref.dtype)


# ------------------------------ tiling / planning ----------------------------------

def _vmem_limit_bytes():
    """Generation-aware budget: ~3/4 of physical VMEM (96 MiB v5e/v6e, 48 MiB v7x)."""
    cap = 64 << 20
    try:
        info = pltpu.get_tpu_info()
        cap = int(getattr(info, "vmem_capacity_bytes", cap)) or cap
    except Exception:
        pass
    return int(min(max(cap * 3 // 4, 32 << 20), 96 << 20))


def _plan(B, C, H, W, itemsize=4):
    """Choose lane packing (G channels x S-wide segments) and the channel-group tile."""
    Hp, Wp = H + 4, W + 4
    if Wp > 128:
        G, S = 1, _cdiv(Wp, 128) * 128
    else:
        cands, g = [], 1
        while g * Wp <= 128:
            cands.append(g)
            g *= 2
        # Fewest padded (8,128) sublane tiles wins; tie-break = least channel padding.
        G = min(cands, key=lambda g: (_cdiv(_cdiv(C, g), 8), g))
        S = 128 // G
    L = G * S
    Cg = _cdiv(C, G)                         # channel-group rows (sublane dim)

    vmem_limit = _vmem_limit_bytes()
    per_row = (Hp + H) * L * itemsize        # input + output bytes per channel-group row
    w_row = 26 * L * itemsize                # 25 taps + bias per channel-group row
    budget = (vmem_limit * 3) // 10          # ~30% of limit per buffer set (x2 dbl-buffer)
    cap = max(1, budget // (per_row + w_row))
    if Cg > 8:
        # Keep >= ~4 grid steps so both v7x TensorCores get work / pipeline has depth.
        cap = min(cap, _cdiv(Cg, _cdiv(4, B)))
    if Cg <= cap:
        TCg, Cg_pad = Cg, Cg
    else:
        TCg = max(8, (cap // 8) * 8)
        Cg_pad = _cdiv(Cg, TCg) * TCg
    # TODO(synk): for very large H*W (e.g. 640x640 on v7x) add an H-tile grid axis with a
    # 2-row halo (wrapper-side halo duplication) instead of relying on TCg=8 fitting VMEM.
    return dict(G=G, S=S, L=L, Hp=Hp, Wp=Wp, Cg_pad=Cg_pad, TCg=TCg, vmem_limit=vmem_limit)


# ----------------------------------- wrapper --------------------------------------

def repdw_forward(x_nchw, params):
    """RepDW forward (eval).  x_nchw: (B, C, H, W) like PyTorch.  Returns NCHW."""
    B, C, H, W = x_nchw.shape
    p = _plan(B, C, H, W, itemsize=jnp.dtype(x_nchw.dtype).itemsize)
    G, S, L, Hp, Wp = p["G"], p["S"], p["L"], p["Hp"], p["Wp"]
    Cg_pad, TCg = p["Cg_pad"], p["TCg"]
    Ctot = Cg_pad * G

    # ---- pack input NCHW -> (B, Hp, Cg_pad, L): one fused pad + transpose pass --------
    xq = jnp.pad(x_nchw, ((0, 0), (0, Ctot - C), (2, 2), (2, 2 + S - Wp)))
    xq = xq.reshape(B, Cg_pad, G, Hp, S)
    xq = jnp.transpose(xq, (0, 3, 1, 2, 4)).reshape(B, Hp, Cg_pad, L)

    # ---- pack weights / bias to the lane layout (tiny; constant-folded by XLA) --------
    w25 = params["w"].reshape(25, C).astype(xq.dtype)               # (5,5,C) -> (25, C)
    bc = params["b"].reshape(C).astype(xq.dtype)
    w25 = jnp.pad(w25, ((0, 0), (0, Ctot - C))).reshape(25, Cg_pad, G, 1)
    wpk = jnp.broadcast_to(w25, (25, Cg_pad, G, S)).reshape(25, Cg_pad, L)
    bpk = jnp.broadcast_to(jnp.pad(bc, (0, Ctot - C)).reshape(Cg_pad, G, 1),
                           (Cg_pad, G, S)).reshape(Cg_pad, L)

    out_packed = pl.pallas_call(
        _repdw_kernel,
        out_shape=jax.ShapeDtypeStruct((B, H, Cg_pad, L), x_nchw.dtype),
        grid_spec=pltpu.PrefetchScalarGridSpec(
            num_scalar_prefetch=0,
            grid=(B, Cg_pad // TCg),
            in_specs=[
                pl.BlockSpec((1, Hp, TCg, L), lambda bi, ci: (bi, 0, ci, 0)),
                pl.BlockSpec((25, TCg, L), lambda bi, ci: (0, ci, 0)),
                pl.BlockSpec((TCg, L), lambda bi, ci: (ci, 0)),
            ],
            out_specs=pl.BlockSpec((1, H, TCg, L), lambda bi, ci: (bi, 0, ci, 0)),
        ),
        compiler_params=pltpu.CompilerParams(
            dimension_semantics=("parallel", "parallel"),
            vmem_limit_bytes=p["vmem_limit"]),
    )(xq, wpk, bpk)

    # ---- unpack (B, H, Cg_pad, L) -> NCHW: one pass ------------------------------------
    # TODO(synk): a fused downstream consumer should take the packed layout directly (or
    # the kernel could emit NCHW via an in-kernel lane->sublane relayout) to drop this pass.
    o = out_packed.reshape(B, H, Cg_pad, G, S)[..., :W]
    o = o.reshape(B, H, Ctot, W)[:, :, :C]
    return jnp.transpose(o, (0, 2, 1, 3))


# --------------------------- parameter setup (deterministic) ----------------------

def fold_bn(w_oihw, gamma, beta, mean, var, eps=1e-5):
    """Fold eval-mode BatchNorm into a bias-free conv (fuse_conv_and_bn semantics)."""
    scale = gamma / jnp.sqrt(var + eps)
    return w_oihw * scale[:, None, None, None], beta - mean * scale


def make_params(c, key):
    keys = jax.random.split(key, 10)

    def randn(k, shape, sc=0.1):
        return sc * jax.random.normal(k, shape, dtype=jnp.float32)

    # RepDW.conv  : depthwise 5x5 (c,1,5,5) + BN
    w5_pt = randn(keys[0], (c, 1, 5, 5))
    g5 = 1.0 + 0.1 * jax.random.normal(keys[1], (c,), jnp.float32)
    bb5, m5 = randn(keys[2], (c,)), randn(keys[3], (c,))
    v5 = jnp.abs(randn(keys[4], (c,))) + 1.0
    # RepDW.conv1 : depthwise 3x3 (c,1,3,3) + BN
    w3_pt = randn(keys[5], (c, 1, 3, 3))
    g3 = 1.0 + 0.1 * jax.random.normal(keys[6], (c,), jnp.float32)
    bb3, m3 = randn(keys[7], (c,)), randn(keys[8], (c,))
    v3 = jnp.abs(randn(keys[9], (c,))) + 1.0

    w5f, b5f = fold_bn(w5_pt, g5, bb5, m5, v5)
    w3f, b3f = fold_bn(w3_pt, g3, bb3, m3, v3)

    # RepDW.fuse(): pad the 3x3 into the 5x5 and add; biases add.
    w5_t = jnp.transpose(w5f[:, 0], (1, 2, 0))               # (5, 5, C)
    w3_t = jnp.transpose(w3f[:, 0], (1, 2, 0))               # (3, 3, C)
    w_eff = w5_t + jnp.pad(w3_t, ((1, 1), (1, 1), (0, 0)))   # (5, 5, C), [dy, dx, c]
    b_eff = b5f + b3f

    kernel_params = dict(w=w_eff, b=b_eff)
    ref_params = dict(w5=w5f, b5=b5f, w3=w3f, b3=b3f)
    return kernel_params, ref_params


# ------------------------------- pure-JAX reference --------------------------------

def reference(x_nchw, rp):
    C = x_nchw.shape[1]
    dn = ("NCHW", "OIHW", "NCHW")
    y5 = lax.conv_general_dilated(x_nchw, rp["w5"], (1, 1), [(2, 2), (2, 2)],
                                  dimension_numbers=dn, feature_group_count=C)
    y5 = y5 + rp["b5"][None, :, None, None]
    y3 = lax.conv_general_dilated(x_nchw, rp["w3"], (1, 1), [(1, 1), (1, 1)],
                                  dimension_numbers=dn, feature_group_count=C)
    y3 = y3 + rp["b3"][None, :, None, None]
    return jax.nn.silu(y5 + y3)


if __name__ == "__main__":
    key = jax.random.PRNGKey(0)
    kx, kp = jax.random.split(key)
    B, C, H, W = 2, 8, 16, 16
    x = jax.random.normal(kx, (B, C, H, W), dtype=jnp.float32)
    params, ref_params = make_params(C, kp)

    fwd = jax.jit(repdw_forward)
    out = jax.block_until_ready(fwd(x, params))
    assert out.shape == (B, C, H, W)

    expected = reference(x, ref_params)
    np.testing.assert_allclose(np.asarray(out), np.asarray(expected),
                               rtol=1e-4, atol=1e-4)
    print("KERNEL_OK")
</pallas_src>

<mosaic_0001>
module attributes {stable_mosaic.version = 11 : i64} {
  func.func @_repdw_kernel(%arg0: i32, %arg1: i32, %arg2: memref<1x20x8x128xf32, #tpu.memory_space<vmem>>, %arg3: memref<25x8x128xf32, #tpu.memory_space<vmem>>, %arg4: memref<8x128xf32, #tpu.memory_space<vmem>>, %arg5: memref<1x16x8x128xf32, #tpu.memory_space<vmem>>) attributes {dimension_semantics = [#tpu.dimension_semantics<parallel>, #tpu.dimension_semantics<parallel>], iteration_bounds = array<i64: 2, 1>, scalar_prefetch = 0 : i64, scratch_operands = 0 : i64, tpu.core_type = #tpu.core_type<tc>, window_params = [{transform_indices = @transform_0, window_bounds = array<i64: 1, 20, 8, 128>}, {transform_indices = @transform_1, window_bounds = array<i64: 25, 8, 128>}, {transform_indices = @transform_2, window_bounds = array<i64: 8, 128>}, {transform_indices = @transform_3, window_bounds = array<i64: 1, 16, 8, 128>}]} {
    %c0 = arith.constant 0 : index
    %c0_0 = arith.constant 0 : index
    %c0_1 = arith.constant 0 : index
    %c0_2 = arith.constant 0 : index
    %0 = vector.load %arg2[%c0, %c0_0, %c0_1, %c0_2] : memref<1x20x8x128xf32, #tpu.memory_space<vmem>>, vector<1x20x8x128xf32>
    %c0_3 = arith.constant 0 : index
    %c0_4 = arith.constant 0 : index
    %c0_5 = arith.constant 0 : index
    %1 = vector.load %arg3[%c0_3, %c0_4, %c0_5] : memref<25x8x128xf32, #tpu.memory_space<vmem>>, vector<25x8x128xf32>
    %2 = vector.extract_strided_slice %0 {offsets = [0, 0, 0, 0], sizes = [1, 16, 8, 128], strides = [1, 1, 1, 1]} : vector<1x20x8x128xf32> to vector<1x16x8x128xf32>
    %3 = vector.extract_strided_slice %1 {offsets = [0, 0, 0], sizes = [1, 8, 128], strides = [1, 1, 1]} : vector<25x8x128xf32> to vector<1x8x128xf32>
    %4 = vector.shape_cast %3 : vector<1x8x128xf32> to vector<8x128xf32>
    %5 = vector.shape_cast %4 : vector<8x128xf32> to vector<1x1x8x128xf32>
    %6 = vector.broadcast %5 : vector<1x1x8x128xf32> to vector<1x16x8x128xf32>
    %7 = arith.mulf %2, %6 : vector<1x16x8x128xf32>
    %8 = vector.extract_strided_slice %0 {offsets = [0, 1, 0, 0], sizes = [1, 16, 8, 128], strides = [1, 1, 1, 1]} : vector<1x20x8x128xf32> to vector<1x16x8x128xf32>
    %9 = vector.extract_strided_slice %1 {offsets = [5, 0, 0], sizes = [1, 8, 128], strides = [1, 1, 1]} : vector<25x8x128xf32> to vector<1x8x128xf32>
    %10 = vector.shape_cast %9 : vector<1x8x128xf32> to vector<8x128xf32>
    %11 = vector.shape_cast %10 : vector<8x128xf32> to vector<1x1x8x128xf32>
    %12 = vector.broadcast %11 : vector<1x1x8x128xf32> to vector<1x16x8x128xf32>
    %13 = arith.mulf %8, %12 : vector<1x16x8x128xf32>
    %14 = arith.addf %7, %13 : vector<1x16x8x128xf32>
    %15 = vector.extract_strided_slice %0 {offsets = [0, 2, 0, 0], sizes = [1, 16, 8, 128], strides = [1, 1, 1, 1]} : vector<1x20x8x128xf32> to vector<1x16x8x128xf32>
    %16 = vector.extract_strided_slice %1 {offsets = [10, 0, 0], sizes = [1, 8, 128], strides = [1, 1, 1]} : vector<25x8x128xf32> to vector<1x8x128xf32>
    %17 = vector.shape_cast %16 : vector<1x8x128xf32> to vector<8x128xf32>
    %18 = vector.shape_cast %17 : vector<8x128xf32> to vector<1x1x8x128xf32>
    %19 = vector.broadcast %18 : vector<1x1x8x128xf32> to vector<1x16x8x128xf32>
    %20 = arith.mulf %15, %19 : vector<1x16x8x128xf32>
    %21 = arith.addf %14, %20 : vector<1x16x8x128xf32>
    %22 = vector.extract_strided_slice %0 {offsets = [0, 3, 0, 0], sizes = [1, 16, 8, 128], strides = [1, 1, 1, 1]} : vector<1x20x8x128xf32> to vector<1x16x8x128xf32>
    %23 = vector.extract_strided_slice %1 {offsets = [15, 0, 0], sizes = [1, 8, 128], strides = [1, 1, 1]} : vector<25x8x128xf32> to vector<1x8x128xf32>
    %24 = vector.shape_cast %23 : vector<1x8x128xf32> to vector<8x128xf32>
    %25 = vector.shape_cast %24 : vector<8x128xf32> to vector<1x1x8x128xf32>
    %26 = vector.broadcast %25 : vector<1x1x8x128xf32> to vector<1x16x8x128xf32>
    %27 = arith.mulf %22, %26 : vector<1x16x8x128xf32>
    %28 = arith.addf %21, %27 : vector<1x16x8x128xf32>
    %29 = vector.extract_strided_slice %0 {offsets = [0, 4, 0, 0], sizes = [1, 16, 8, 128], strides = [1, 1, 1, 1]} : vector<1x20x8x128xf32> to vector<1x16x8x128xf32>
    %30 = vector.extract_strided_slice %1 {offsets = [20, 0, 0], sizes = [1, 8, 128], strides = [1, 1, 1]} : vector<25x8x128xf32> to vector<1x8x128xf32>
    %31 = vector.shape_cast %30 : vector<1x8x128xf32> to vector<8x128xf32>
    %32 = vector.shape_cast %31 : vector<8x128xf32> to vector<1x1x8x128xf32>
    %33 = vector.broadcast %32 : vector<1x1x8x128xf32> to vector<1x16x8x128xf32>
    %34 = arith.mulf %29, %33 : vector<1x16x8x128xf32>
    %35 = arith.addf %28, %34 : vector<1x16x8x128xf32>
    %c127_i32 = arith.constant 127 : i32
    %36 = tpu.dynamic_rotate %0 by %c127_i32 dim 3 : vector<1x20x8x128xf32>, i32 -> vector<1x20x8x128xf32>
    %37 = vector.extract_strided_slice %36 {offsets = [0, 0, 0, 0], sizes = [1, 16, 8, 128], strides = [1, 1, 1, 1]} : vector<1x20x8x128xf32> to vector<1x16x8x128xf32>
    %38 = vector.extract_strided_slice %1 {offsets = [1, 0, 0], sizes = [1, 8, 128], strides = [1, 1, 1]} : vector<25x8x128xf32> to vector<1x8x128xf32>
    %39 = vector.shape_cast %38 : vector<1x8x128xf32> to vector<8x128xf32>
    %40 = vector.shape_cast %39 : vector<8x128xf32> to vector<1x1x8x128xf32>
    %41 = vector.broadcast %40 : vector<1x1x8x128xf32> to vector<1x16x8x128xf32>
    %42 = arith.mulf %37, %41 : vector<1x16x8x128xf32>
    %43 = arith.addf %35, %42 : vector<1x16x8x128xf32>
    %44 = vector.extract_strided_slice %36 {offsets = [0, 1, 0, 0], sizes = [1, 16, 8, 128], strides = [1, 1, 1, 1]} : vector<1x20x8x128xf32> to vector<1x16x8x128xf32>
    %45 = vector.extract_strided_slice %1 {offsets = [6, 0, 0], sizes = [1, 8, 128], strides = [1, 1, 1]} : vector<25x8x128xf32> to vector<1x8x128xf32>
    %46 = vector.shape_cast %45 : vector<1x8x128xf32> to vector<8x128xf32>
    %47 = vector.shape_cast %46 : vector<8x128xf32> to vector<1x1x8x128xf32>
    %48 = vector.broadcast %47 : vector<1x1x8x128xf32> to vector<1x16x8x128xf32>
    %49 = arith.mulf %44, %48 : vector<1x16x8x128xf32>
    %50 = arith.addf %43, %49 : vector<1x16x8x128xf32>
    %51 = vector.extract_strided_slice %36 {offsets = [0, 2, 0, 0], sizes = [1, 16, 8, 128], strides = [1, 1, 1, 1]} : vector<1x20x8x128xf32> to vector<1x16x8x128xf32>
    %52 = vector.extract_strided_slice %1 {offsets = [11, 0, 0], sizes = [1, 8, 128], strides = [1, 1, 1]} : vector<25x8x128xf32> to vector<1x8x128xf32>
    %53 = vector.shape_cast %52 : vector<1x8x128xf32> to vector<8x128xf32>
    %54 = vector.shape_cast %53 : vector<8x128xf32> to vector<1x1x8x128xf32>
    %55 = vector.broadcast %54 : vector<1x1x8x128xf32> to vector<1x16x8x128xf32>
    %56 = arith.mulf %51, %55 : vector<1x16x8x128xf32>
    %57 = arith.addf %50, %56 : vector<1x16x8x128xf32>
    %58 = vector.extract_strided_slice %36 {offsets = [0, 3, 0, 0], sizes = [1, 16, 8, 128], strides = [1, 1, 1, 1]} : vector<1x20x8x128xf32> to vector<1x16x8x128xf32>
    %59 = vector.extract_strided_slice %1 {offsets = [16, 0, 0], sizes = [1, 8, 128], strides = [1, 1, 1]} : vector<25x8x128xf32> to vector<1x8x128xf32>
    %60 = vector.shape_cast %59 : vector<1x8x128xf32> to vector<8x128xf32>
    %61 = vector.shape_cast %60 : vector<8x128xf32> to vector<1x1x8x128xf32>
    %62 = vector.broadcast %61 : vector<1x1x8x128xf32> to vector<1x16x8x128xf32>
    %63 = arith.mulf %58, %62 : vector<1x16x8x128xf32>
    %64 = arith.addf %57, %63 : vector<1x16x8x128xf32>
    %65 = vector.extract_strided_slice %36 {offsets = [0, 4, 0, 0], sizes = [1, 16, 8, 128], strides = [1, 1, 1, 1]} : vector<1x20x8x128xf32> to vector<1x16x8x128xf32>
    %66 = vector.extract_strided_slice %1 {offsets = [21, 0, 0], sizes = [1, 8, 128], strides = [1, 1, 1]} : vector<25x8x128xf32> to vector<1x8x128xf32>
    %67 = vector.shape_cast %66 : vector<1x8x128xf32> to vector<8x128xf32>
    %68 = vector.shape_cast %67 : vector<8x128xf32> to vector<1x1x8x128xf32>
    %69 = vector.broadcast %68 : vector<1x1x8x128xf32> to vector<1x16x8x128xf32>
    %70 = arith.mulf %65, %69 : vector<1x16x8x128xf32>
    %71 = arith.addf %64, %70 : vector<1x16x8x128xf32>
    %c126_i32 = arith.constant 126 : i32
    %72 = tpu.dynamic_rotate %0 by %c126_i32 dim 3 : vector<1x20x8x128xf32>, i32 -> vector<1x20x8x128xf32>
    %73 = vector.extract_strided_slice %72 {offsets = [0, 0, 0, 0], sizes = [1, 16, 8, 128], strides = [1, 1, 1, 1]} : vector<1x20x8x128xf32> to vector<1x16x8x128xf32>
    %74 = vector.extract_strided_slice %1 {offsets = [2, 0, 0], sizes = [1, 8, 128], strides = [1, 1, 1]} : vector<25x8x128xf32> to vector<1x8x128xf32>
    %75 = vector.shape_cast %74 : vector<1x8x128xf32> to vector<8x128xf32>
    %76 = vector.shape_cast %75 : vector<8x128xf32> to vector<1x1x8x128xf32>
    %77 = vector.broadcast %76 : vector<1x1x8x128xf32> to vector<1x16x8x128xf32>
    %78 = arith.mulf %73, %77 : vector<1x16x8x128xf32>
    %79 = arith.addf %71, %78 : vector<1x16x8x128xf32>
    %80 = vector.extract_strided_slice %72 {offsets = [0, 1, 0, 0], sizes = [1, 16, 8, 128], strides = [1, 1, 1, 1]} : vector<1x20x8x128xf32> to vector<1x16x8x128xf32>
    %81 = vector.extract_strided_slice %1 {offsets = [7, 0, 0], sizes = [1, 8, 128], strides = [1, 1, 1]} : vector<25x8x128xf32> to vector<1x8x128xf32>
    %82 = vector.shape_cast %81 : vector<1x8x128xf32> to vector<8x128xf32>
    %83 = vector.shape_cast %82 : vector<8x128xf32> to vector<1x1x8x128xf32>
    %84 = vector.broadcast %83 : vector<1x1x8x128xf32> to vector<1x16x8x128xf32>
    %85 = arith.mulf %80, %84 : vector<1x16x8x128xf32>
    %86 = arith.addf %79, %85 : vector<1x16x8x128xf32>
    %87 = vector.extract_strided_slice %72 {offsets = [0, 2, 0, 0], sizes = [1, 16, 8, 128], strides = [1, 1, 1, 1]} : vector<1x20x8x128xf32> to vector<1x16x8x128xf32>
    %88 = vector.extract_strided_slice %1 {offsets = [12, 0, 0], sizes = [1, 8, 128], strides = [1, 1, 1]} : vector<25x8x128xf32> to vector<1x8x128xf32>
    %89 = vector.shape_cast %88 : vector<1x8x128xf32> to vector<8x128xf32>
    %90 = vector.shape_cast %89 : vector<8x128xf32> to vector<1x1x8x128xf32>
    %91 = vector.broadcast %90 : vector<1x1x8x128xf32> to vector<1x16x8x128xf32>
    %92 = arith.mulf %87, %91 : vector<1x16x8x128xf32>
    %93 = arith.addf %86, %92 : vector<1x16x8x128xf32>
    %94 = vector.extract_strided_slice %72 {offsets = [0, 3, 0, 0], sizes = [1, 16, 8, 128], strides = [1, 1, 1, 1]} : vector<1x20x8x128xf32> to vector<1x16x8x128xf32>
    %95 = vector.extract_strided_slice %1 {offsets = [17, 0, 0], sizes = [1, 8, 128], strides = [1, 1, 1]} : vector<25x8x128xf32> to vector<1x8x128xf32>
    %96 = vector.shape_cast %95 : vector<1x8x128xf32> to vector<8x128xf32>
    %97 = vector.shape_cast %96 : vector<8x128xf32> to vector<1x1x8x128xf32>
    %98 = vector.broadcast %97 : vector<1x1x8x128xf32> to vector<1x16x8x128xf32>
    %99 = arith.mulf %94, %98 : vector<1x16x8x128xf32>
    %100 = arith.addf %93, %99 : vector<1x16x8x128xf32>
    %101 = vector.extract_strided_slice %72 {offsets = [0, 4, 0, 0], sizes = [1, 16, 8, 128], strides = [1, 1, 1, 1]} : vector<1x20x8x128xf32> to vector<1x16x8x128xf32>
    %102 = vector.extract_strided_slice %1 {offsets = [22, 0, 0], sizes = [1, 8, 128], strides = [1, 1, 1]} : vector<25x8x128xf32> to vector<1x8x128xf32>
    %103 = vector.shape_cast %102 : vector<1x8x128xf32> to vector<8x128xf32>
    %104 = vector.shape_cast %103 : vector<8x128xf32> to vector<1x1x8x128xf32>
    %105 = vector.broadcast %104 : vector<1x1x8x128xf32> to vector<1x16x8x128xf32>
    %106 = arith.mulf %101, %105 : vector<1x16x8x128xf32>
    %107 = arith.addf %100, %106 : vector<1x16x8x128xf32>
    %c125_i32 = arith.constant 125 : i32
    %108 = tpu.dynamic_rotate %0 by %c125_i32 dim 3 : vector<1x20x8x128xf32>, i32 -> vector<1x20x8x128xf32>
    %109 = vector.extract_strided_slice %108 {offsets = [0, 0, 0, 0], sizes = [1, 16, 8, 128], strides = [1, 1, 1, 1]} : vector<1x20x8x128xf32> to vector<1x16x8x128xf32>
    %110 = vector.extract_strided_slice %1 {offsets = [3, 0, 0], sizes = [1, 8, 128], strides = [1, 1, 1]} : vector<25x8x128xf32> to vector<1x8x128xf32>
    %111 = vector.shape_cast %110 : vector<1x8x128xf32> to vector<8x128xf32>
    %112 = vector.shape_cast %111 : vector<8x128xf32> to vector<1x1x8x128xf32>
    %113 = vector.broadcast %112 : vector<1x1x8x128xf32> to vector<1x16x8x128xf32>
    %114 = arith.mulf %109, %113 : vector<1x16x8x128xf32>
    %115 = arith.addf %107, %114 : vector<1x16x8x128xf32>
    %116 = vector.extract_strided_slice %108 {offsets = [0, 1, 0, 0], sizes = [1, 16, 8, 128], strides = [1, 1, 1, 1]} : vector<1x20x8x128xf32> to vector<1x16x8x128xf32>
    %117 = vector.extract_strided_slice %1 {offsets = [8, 0, 0], sizes = [1, 8, 128], strides = [1, 1, 1]} : vector<25x8x128xf32> to vector<1x8x128xf32>
    %118 = vector.shape_cast %117 : vector<1x8x128xf32> to vector<8x128xf32>
    %119 = vector.shape_cast %118 : vector<8x128xf32> to vector<1x1x8x128xf32>
    %120 = vector.broadcast %119 : vector<1x1x8x128xf32> to vector<1x16x8x128xf32>
    %121 = arith.mulf %116, %120 : vector<1x16x8x128xf32>
    %122 = arith.addf %115, %121 : vector<1x16x8x128xf32>
    %123 = vector.extract_strided_slice %108 {offsets = [0, 2, 0, 0], sizes = [1, 16, 8, 128], strides = [1, 1, 1, 1]} : vector<1x20x8x128xf32> to vector<1x16x8x128xf32>
    %124 = vector.extract_strided_slice %1 {offsets = [13, 0, 0], sizes = [1, 8, 128], strides = [1, 1, 1]} : vector<25x8x128xf32> to vector<1x8x128xf32>
    %125 = vector.shape_cast %124 : vector<1x8x128xf32> to vector<8x128xf32>
    %126 = vector.shape_cast %125 : vector<8x128xf32> to vector<1x1x8x128xf32>
    %127 = vector.broadcast %126 : vector<1x1x8x128xf32> to vector<1x16x8x128xf32>
    %128 = arith.mulf %123, %127 : vector<1x16x8x128xf32>
    %129 = arith.addf %122, %128 : vector<1x16x8x128xf32>
    %130 = vector.extract_strided_slice %108 {offsets = [0, 3, 0, 0], sizes = [1, 16, 8, 128], strides = [1, 1, 1, 1]} : vector<1x20x8x128xf32> to vector<1x16x8x128xf32>
    %131 = vector.extract_strided_slice %1 {offsets = [18, 0, 0], sizes = [1, 8, 128], strides = [1, 1, 1]} : vector<25x8x128xf32> to vector<1x8x128xf32>
    %132 = vector.shape_cast %131 : vector<1x8x128xf32> to vector<8x128xf32>
    %133 = vector.shape_cast %132 : vector<8x128xf32> to vector<1x1x8x128xf32>
    %134 = vector.broadcast %133 : vector<1x1x8x128xf32> to vector<1x16x8x128xf32>
    %135 = arith.mulf %130, %134 : vector<1x16x8x128xf32>
    %136 = arith.addf %129, %135 : vector<1x16x8x128xf32>
    %137 = vector.extract_strided_slice %108 {offsets = [0, 4, 0, 0], sizes = [1, 16, 8, 128], strides = [1, 1, 1, 1]} : vector<1x20x8x128xf32> to vector<1x16x8x128xf32>
    %138 = vector.extract_strided_slice %1 {offsets = [23, 0, 0], sizes = [1, 8, 128], strides = [1, 1, 1]} : vector<25x8x128xf32> to vector<1x8x128xf32>
    %139 = vector.shape_cast %138 : vector<1x8x128xf32> to vector<8x128xf32>
    %140 = vector.shape_cast %139 : vector<8x128xf32> to vector<1x1x8x128xf32>
    %141 = vector.broadcast %140 : vector<1x1x8x128xf32> to vector<1x16x8x128xf32>
    %142 = arith.mulf %137, %141 : vector<1x16x8x128xf32>
    %143 = arith.addf %136, %142 : vector<1x16x8x128xf32>
    %c124_i32 = arith.constant 124 : i32
    %144 = tpu.dynamic_rotate %0 by %c124_i32 dim 3 : vector<1x20x8x128xf32>, i32 -> vector<1x20x8x128xf32>
    %145 = vector.extract_strided_slice %144 {offsets = [0, 0, 0, 0], sizes = [1, 16, 8, 128], strides = [1, 1, 1, 1]} : vector<1x20x8x128xf32> to vector<1x16x8x128xf32>
    %146 = vector.extract_strided_slice %1 {offsets = [4, 0, 0], sizes = [1, 8, 128], strides = [1, 1, 1]} : vector<25x8x128xf32> to vector<1x8x128xf32>
    %147 = vector.shape_cast %146 : vector<1x8x128xf32> to vector<8x128xf32>
    %148 = vector.shape_cast %147 : vector<8x128xf32> to vector<1x1x8x128xf32>
    %149 = vector.broadcast %148 : vector<1x1x8x128xf32> to vector<1x16x8x128xf32>
    %150 = arith.mulf %145, %149 : vector<1x16x8x128xf32>
    %151 = arith.addf %143, %150 : vector<1x16x8x128xf32>
    %152 = vector.extract_strided_slice %144 {offsets = [0, 1, 0, 0], sizes = [1, 16, 8, 128], strides = [1, 1, 1, 1]} : vector<1x20x8x128xf32> to vector<1x16x8x128xf32>
    %153 = vector.extract_strided_slice %1 {offsets = [9, 0, 0], sizes = [1, 8, 128], strides = [1, 1, 1]} : vector<25x8x128xf32> to vector<1x8x128xf32>
    %154 = vector.shape_cast %153 : vector<1x8x128xf32> to vector<8x128xf32>
    %155 = vector.shape_cast %154 : vector<8x128xf32> to vector<1x1x8x128xf32>
    %156 = vector.broadcast %155 : vector<1x1x8x128xf32> to vector<1x16x8x128xf32>
    %157 = arith.mulf %152, %156 : vector<1x16x8x128xf32>
    %158 = arith.addf %151, %157 : vector<1x16x8x128xf32>
    %159 = vector.extract_strided_slice %144 {offsets = [0, 2, 0, 0], sizes = [1, 16, 8, 128], strides = [1, 1, 1, 1]} : vector<1x20x8x128xf32> to vector<1x16x8x128xf32>
    %160 = vector.extract_strided_slice %1 {offsets = [14, 0, 0], sizes = [1, 8, 128], strides = [1, 1, 1]} : vector<25x8x128xf32> to vector<1x8x128xf32>
    %161 = vector.shape_cast %160 : vector<1x8x128xf32> to vector<8x128xf32>
    %162 = vector.shape_cast %161 : vector<8x128xf32> to vector<1x1x8x128xf32>
    %163 = vector.broadcast %162 : vector<1x1x8x128xf32> to vector<1x16x8x128xf32>
    %164 = arith.mulf %159, %163 : vector<1x16x8x128xf32>
    %165 = arith.addf %158, %164 : vector<1x16x8x128xf32>
    %166 = vector.extract_strided_slice %144 {offsets = [0, 3, 0, 0], sizes = [1, 16, 8, 128], strides = [1, 1, 1, 1]} : vector<1x20x8x128xf32> to vector<1x16x8x128xf32>
    %167 = vector.extract_strided_slice %1 {offsets = [19, 0, 0], sizes = [1, 8, 128], strides = [1, 1, 1]} : vector<25x8x128xf32> to vector<1x8x128xf32>
    %168 = vector.shape_cast %167 : vector<1x8x128xf32> to vector<8x128xf32>
    %169 = vector.shape_cast %168 : vector<8x128xf32> to vector<1x1x8x128xf32>
    %170 = vector.broadcast %169 : vector<1x1x8x128xf32> to vector<1x16x8x128xf32>
    %171 = arith.mulf %166, %170 : vector<1x16x8x128xf32>
    %172 = arith.addf %165, %171 : vector<1x16x8x128xf32>
    %173 = vector.extract_strided_slice %144 {offsets = [0, 4, 0, 0], sizes = [1, 16, 8, 128], strides = [1, 1, 1, 1]} : vector<1x20x8x128xf32> to vector<1x16x8x128xf32>
    %174 = vector.extract_strided_slice %1 {offsets = [24, 0, 0], sizes = [1, 8, 128], strides = [1, 1, 1]} : vector<25x8x128xf32> to vector<1x8x128xf32>
    %175 = vector.shape_cast %174 : vector<1x8x128xf32> to vector<8x128xf32>
    %176 = vector.shape_cast %175 : vector<8x128xf32> to vector<1x1x8x128xf32>
    %177 = vector.broadcast %176 : vector<1x1x8x128xf32> to vector<1x16x8x128xf32>
    %178 = arith.mulf %173, %177 : vector<1x16x8x128xf32>
    %179 = arith.addf %172, %178 : vector<1x16x8x128xf32>
    %c0_6 = arith.constant 0 : index
    %c0_7 = arith.constant 0 : index
    %180 = vector.load %arg4[%c0_6, %c0_7] : memref<8x128xf32, #tpu.memory_space<vmem>>, vector<8x128xf32>
    %181 = vector.shape_cast %180 : vector<8x128xf32> to vector<1x1x8x128xf32>
    %182 = vector.broadcast %181 : vector<1x1x8x128xf32> to vector<1x16x8x128xf32>
    %183 = arith.addf %179, %182 : vector<1x16x8x128xf32>
    %cst = arith.constant 0.000000e+00 : f32
    %184 = vector.broadcast %cst : f32 to vector<1x16x8x128xf32>
    %185 = arith.subf %184, %183 : vector<1x16x8x128xf32>
    %186 = math.exp %185 : vector<1x16x8x128xf32>
    %cst_8 = arith.constant 1.000000e+00 : f32
    %187 = vector.broadcast %cst_8 : f32 to vector<1x16x8x128xf32>
    %188 = arith.addf %187, %186 : vector<1x16x8x128xf32>
    %189 = tpu.reciprocal %188 : vector<1x16x8x128xf32> -> vector<1x16x8x128xf32>
    %190 = arith.mulf %183, %189 : vector<1x16x8x128xf32>
    %c0_9 = arith.constant 0 : index
    %c0_10 = arith.constant 0 : index
    %c0_11 = arith.constant 0 : index
    %c0_12 = arith.constant 0 : index
    %191 = vector.load %arg5[%c0_9, %c0_10, %c0_11, %c0_12] : memref<1x16x8x128xf32, #tpu.memory_space<vmem>>, vector<1x16x8x128xf32>
    tpu.vector_store %arg5[%c0_9, %c0_10, %c0_11, %c0_12], %190 {strides = array<i32>} : memref<1x16x8x128xf32, #tpu.memory_space<vmem>>, vector<1x16x8x128xf32>,
    return
  }
  func.func @transform_0(%arg0: i32, %arg1: i32) -> (i32, i32, i32, i32) {
    %c0_i32 = arith.constant 0 : i32
    %c0_i32_0 = arith.constant 0 : i32
    %c0_i32_1 = arith.constant 0 : i32
    return %arg0, %c0_i32, %arg1, %c0_i32_0 : i32, i32, i32, i32
  }
  func.func @transform_1(%arg0: i32, %arg1: i32) -> (i32, i32, i32) {
    %c0_i32 = arith.constant 0 : i32
    %c0_i32_0 = arith.constant 0 : i32
    %c0_i32_1 = arith.constant 0 : i32
    return %c0_i32, %arg1, %c0_i32_0 : i32, i32, i32
  }
  func.func @transform_2(%arg0: i32, %arg1: i32) -> (i32, i32) {
    %c0_i32 = arith.constant 0 : i32
    %c0_i32_0 = arith.constant 0 : i32
    return %arg1, %c0_i32 : i32, i32
  }
  func.func @transform_3(%arg0: i32, %arg1: i32) -> (i32, i32, i32, i32) {
    %c0_i32 = arith.constant 0 : i32
    %c0_i32_0 = arith.constant 0 : i32
    %c0_i32_1 = arith.constant 0 : i32
    return %arg0, %c0_i32, %arg1, %c0_i32_0 : i32, i32, i32, i32
  }
}

</mosaic_0001>

<bundles_post_ra>
// kernel: repdw_forward.1
= control target key start
LH: loop header
LB: loop body
LE: loop exit
PB: predicated region body
PF: predicated region fallthrough
CT: control target
= control target key end

     0   :  { %s1622_s12 = smov 0   ;;  %s1624_s13 = smov 0   ;;  %s2884_s0 = inlined_call_operand.vmem [shape: f32[2,20,8,128], index: 0, kind: input, shape index: {}]   ;;  %s2885_s1 = inlined_call_operand.vmem [shape: f32[25,8,128], index: 1, kind: input, shape index: {}]   ;;  %s2886_s2 = inlined_call_operand.vmem [shape: f32[8,128], index: 2, kind: input, shape index: {}]   ;;  %s2887_s3 = inlined_call_operand.vmem [shape: f32[2,16,8,128], index: 3, kind: output, shape index: {}]  }
   0x1   :  { %s1626_s14 = smov 0  }
   0x2 LB: > { %s25_s15 = sadd.s32 1, %s1592_s13  ;;  %p1474_p0 = scmp.ge.s32.totalorder %s1596_s14, 1  ;;  %s1596_s14 = sphi %s1626_s14, %s13_s14   ;;  %s1592_s13 = sphi %s1624_s13, %s2889_s13   ;;  %s1588_s12 = sphi %s1622_s12, %s2888_s12  }
   0x3   : > { %p27_p1 = scmp.ge.s32.totalorder %s25_s15, 2  ;;  %p174_p2 = scmp.lt.s32.totalorder %s1596_s14, 3 }
   0x5   : > { %s2891_s15 = smov (%p27_p1, %s25_s15), 0  ;;  %p175_p3 = pnand %p1474_p0, %p174_p2 }
   0x6   : > { %p212_p4 = scmp.lt.s32.totalorder (!%p175_p3), %s1588_s12, 1  ;;  %s1598_s20 = smov (!%p175_p3), 127   ;;  %v1769_v20 = vld [vmem:[%s2885_s1] sm:$0xff] (!%p175_p3)  ;;  %v1776_v21 = vld [vmem:[%s2885_s1 + $0x28] sm:$0xff] (!%p175_p3)  ;;  %v1791_v25 = vld [vmem:[%s2885_s1 + $0x50] sm:$0xff] (!%p175_p3) }
   0x7   : > { %178 = sbr.rel (%p175_p3) target bundleno = 357 (0x165), region = 32  ;;  %s1599_s21 = smov (!%p175_p3), 126   ;;  %v1806_v31 = vld [vmem:[%s2885_s1 + $0x78] sm:$0xff] (!%p175_p3)  ;;  %v1831_v44 = vld [vmem:[%s2885_s1 + $0xa0] sm:$0xff] (!%p175_p3) }
   0x8   : > { %s1600_s26 = smov (!%p175_p3), 125   ;;  %s1601_s18 = smov (!%p175_p3), 124  }
   0xe   : > { %s2893_s12 = smov (!%p212_p4, %s1588_s12), 1 }
   0xf   : > { %s1481_s16 = smul.u32 160, %s2893_s12  ;;  %s1480_s30 = sshll.u32 %s2893_s12, 7 }
  0x10   : > { %s2797_s5 = scalar_lea.vmem %s2887_s3, %s1480_s30 }
  0x11   : > { %s1646_s19 = scalar_lea.vmem %s2884_s0, %s1481_s16 }
  0x12   : > { %v1649_v0 = vld [vmem:[%s1646_s19 + $0x10] sm:$0xff]  ;;  %v1652_v1 = vld [vmem:[%s1646_s19] sm:$0xff]  ;;  %v1659_v2 = vld [vmem:[%s1646_s19 + $0x18] sm:$0xff] }
  0x13   : > { %429 = vrot.lane.b32.xlu1 %v1649_v0, %s1598_s20  ;;  %425 = vrot.lane.b32.xlu0 %v1652_v1, %s1598_s20  ;;  %v1662_v3 = vld [vmem:[%s1646_s19 + $0x8] sm:$0xff]  ;;  %v1672_v5 = vld [vmem:[%s1646_s19 + $0x20] sm:$0xff]  ;;  %v281_v22 = vmul.f32 %v1769_v20, %v1652_v1  ;;  %v299_v23 = vmul.f32 %v1776_v21, %v1659_v2  ;;  %v283_v24 = vmul.f32 %v1769_v20, %v1649_v0 }
  0x14   : > { %v1669_v4 = vld [vmem:[%s1646_s19 + $0x28] sm:$0xff]  ;;  %v1679_v6 = vld [vmem:[%s1646_s19 + $0x38] sm:$0xff]  ;;  %v1682_v7 = vld [vmem:[%s1646_s19 + $0x30] sm:$0xff]  ;;  %v297_v26 = vmul.f32 %v1776_v21, %v1662_v3  ;;  %v284_v27 = vmul.f32 %v1769_v20, %v1659_v2  ;;  %v300_v28 = vmul.f32 %v1776_v21, %v1672_v5  ;;  %v282_v29 = vmul.f32 %v1769_v20, %v1662_v3 }
  0x15   : > { %v1689_v8 = vld [vmem:[%s1646_s19 + $0x48] sm:$0xff]  ;;  %v1692_v9 = vld [vmem:[%s1646_s19 + $0x40] sm:$0xff]  ;;  %v1699_v10 = vld [vmem:[%s1646_s19 + $0x58] sm:$0xff]  ;;  %v298_v30 = vmul.f32 %v1776_v21, %v1649_v0  ;;  %v286_v32 = vmul.f32 %v1769_v20, %v1669_v4  ;;  %v302_v33 = vmul.f32 %v1776_v21, %v1682_v7  ;;  %v331_v34 = vmul.f32 %v1791_v25, %v1672_v5 }
  0x16   : > { %v1702_v11 = vld [vmem:[%s1646_s19 + $0x50] sm:$0xff]  ;;  %v1709_v12 = vld [vmem:[%s1646_s19 + $0x68] sm:$0xff]  ;;  %v1712_v13 = vld [vmem:[%s1646_s19 + $0x60] sm:$0xff]  ;;  %v315_v35 = vadd.f32 %v299_v23, %v283_v24  ;;  %v329_v36 = vmul.f32 %v1791_v25, %v1649_v0  ;;  %v313_v37 = vadd.f32 %v297_v26, %v281_v22  ;;  %v316_v38 = vadd.f32 %v300_v28, %v284_v27 }
  0x17   : > { %431 = vrot.lane.b32.xlu1 %v1659_v2, %s1598_s20  ;;  %427 = vrot.lane.b32.xlu0 %v1662_v3, %s1598_s20  ;;  %v1719_v14 = vld [vmem:[%s1646_s19 + $0x78] sm:$0xff]  ;;  %v1722_v15 = vld [vmem:[%s1646_s19 + $0x70] sm:$0xff]  ;;  %v332_v39 = vmul.f32 %v1791_v25, %v1669_v4  ;;  %v363_v40 = vmul.f32 %v1806_v31, %v1669_v4  ;;  %v361_v41 = vmul.f32 %v1806_v31, %v1659_v2 }
  0x18   : > { %v1729_v16 = vld [vmem:[%s1646_s19 + $0x88] sm:$0xff]  ;;  %v1732_v17 = vld [vmem:[%s1646_s19 + $0x80] sm:$0xff]  ;;  %v1739_v18 = vld [vmem:[%s1646_s19 + $0x98] sm:$0xff]  ;;  %v314_v42 = vadd.f32 %v298_v30, %v282_v29  ;;  %v330_v43 = vmul.f32 %v1791_v25, %v1659_v2  ;;  %v318_v45 = vadd.f32 %v302_v33, %v286_v32  ;;  %v334_v46 = vmul.f32 %v1791_v25, %v1679_v6 }
  0x19   : > { %v1742_v19 = vld [vmem:[%s1646_s19 + $0x90] sm:$0xff]  ;;  %v285_v47 = vmul.f32 %v1769_v20, %v1672_v5  ;;  %v301_v48 = vmul.f32 %v1776_v21, %v1669_v4  ;;  %v395_v49 = vmul.f32 %v1831_v44, %v1682_v7  ;;  %v347_v50 = vadd.f32 %v331_v34, %v315_v35 }
  0x1a   : > { %v288_v51 = vmul.f32 %v1769_v20, %v1679_v6  ;;  %v304_v52 = vmul.f32 %v1776_v21, %v1692_v9  ;;  %v345_v53 = vadd.f32 %v329_v36, %v313_v37  ;;  %v348_v54 = vadd.f32 %v332_v39, %v316_v38 }
  0x1b   : > { %435 = vrot.lane.b32.xlu1 %v1669_v4, %s1598_s20  ;;  %433 = vrot.lane.b32.xlu0 %v1672_v5, %s1598_s20  ;;  %v364_v55 = vmul.f32 %v1806_v31, %v1682_v7  ;;  %v346_v56 = vadd.f32 %v330_v43, %v314_v42  ;;  %v362_v57 = vmul.f32 %v1806_v31, %v1672_v5 }
  0x1c   : > { %v287_v58 = vmul.f32 %v1769_v20, %v1682_v7  ;;  %v303_v59 = vmul.f32 %v1776_v21, %v1679_v6  ;;  %v350_v60 = vadd.f32 %v334_v46, %v318_v45  ;;  %v366_v61 = vmul.f32 %v1806_v31, %v1692_v9 }
  0x1d   : > { %v317_v62 = vadd.f32 %v301_v48, %v285_v47  ;;  %v333_v63 = vmul.f32 %v1791_v25, %v1682_v7  ;;  %v379_v22 = vadd.f32 %v363_v40, %v347_v50  ;;  %v393_v23 = vmul.f32 %v1831_v44, %v1672_v5 }
  0x1e   : > { %v320_v24 = vadd.f32 %v304_v52, %v288_v51  ;;  %v336_v26 = vmul.f32 %v1791_v25, %v1689_v8  ;;  %v377_v27 = vadd.f32 %v361_v41, %v345_v53  ;;  %v380_v28 = vadd.f32 %v364_v55, %v348_v54 }
  0x1f   : > { %439 = vrot.lane.b32.xlu1 %v1679_v6, %s1598_s20  ;;  %437 = vrot.lane.b32.xlu0 %v1682_v7, %s1598_s20  ;;  %v396_v29 = vmul.f32 %v1831_v44, %v1679_v6  ;;  %v394_v30 = vmul.f32 %v1831_v44, %v1669_v4  ;;  %v398_v32 = vmul.f32 %v1831_v44, %v1689_v8 }
  0x20   : > { %v319_v33 = vadd.f32 %v303_v59, %v287_v58  ;;  %v335_v34 = vmul.f32 %v1791_v25, %v1692_v9  ;;  %v378_v35 = vadd.f32 %v362_v57, %v346_v56  ;;  %v382_v36 = vadd.f32 %v366_v61, %v350_v60 }
  0x21   : > { %v349_v37 = vadd.f32 %v333_v63, %v317_v62  ;;  %v365_v38 = vmul.f32 %v1806_v31, %v1679_v6  ;;  %v1881_v39 = vmul.f32 %v1831_v44, %v1739_v18  ;;  %v1883_v40 = vadd.f32 %v395_v49, %v379_v22 }
  0x22   : > { %v352_v41 = vadd.f32 %v336_v26, %v320_v24  ;;  %v368_v42 = vmul.f32 %v1806_v31, %v1702_v11  ;;  %v1891_v43 = vadd.f32 %v393_v23, %v377_v27  ;;  %v1893_v45 = vadd.f32 %v396_v29, %v380_v28 }
  0x23   : > { %443 = vrot.lane.b32.xlu1 %v1689_v8, %s1598_s20  ;;  %441 = vrot.lane.b32.xlu0 %v1692_v9, %s1598_s20  ;;  %v1897_v46 = vmul.f32 %v1831_v44, %v1692_v9  ;;  %v351_v47 = vadd.f32 %v335_v34, %v319_v33  ;;  %v367_v48 = vmul.f32 %v1806_v31, %v1689_v8 }
  0x24   : > { %v290_v49 = vmul.f32 %v1769_v20, %v1689_v8  ;;  %v306_v50 = vmul.f32 %v1776_v21, %v1702_v11  ;;  %v1905_v51 = vadd.f32 %v394_v30, %v378_v35  ;;  %v1907_v52 = vadd.f32 %v398_v32, %v382_v36 }
  0x25   : > { %v1909_v53 = vadd.f32 %v365_v38, %v349_v37  ;;  %v1913_v54 = vmul.f32 %v1831_v44, %v1699_v10  ;;  %v1915_v55 = vadd.f32 %v368_v42, %v352_v41  ;;  %v1919_v56 = vmul.f32 %v1831_v44, %v1702_v11 }
  0x26   : > { %v338_v57 = vmul.f32 %v1791_v25, %v1699_v10  ;;  %v370_v58 = vmul.f32 %v1806_v31, %v1712_v13  ;;  %v1931_v59 = vmul.f32 %v1831_v44, %v1709_v12  ;;  %v289_v60 = vmul.f32 %v1769_v20, %v1692_v9 }
  0x27   : > { %447 = vrot.lane.b32.xlu1 %v1699_v10, %s1598_s20  ;;  %445 = vrot.lane.b32.xlu0 %v1702_v11, %s1598_s20  ;;  %v305_v61 = vmul.f32 %v1776_v21, %v1689_v8  ;;  %v1937_v62 = vadd.f32 %v367_v48, %v351_v47  ;;  %v322_v63 = vadd.f32 %v306_v50, %v290_v49 }
  0x28   : > { %v292_v22 = vmul.f32 %v1769_v20, %v1699_v10  ;;  %v308_v23 = vmul.f32 %v1776_v21, %v1712_v13  ;;  %v291_v24 = vmul.f32 %v1769_v20, %v1702_v11  ;;  %v307_v26 = vmul.f32 %v1776_v21, %v1699_v10 }
  0x29   : > { %v294_v27 = vmul.f32 %v1769_v20, %v1709_v12  ;;  %v310_v28 = vmul.f32 %v1776_v21, %v1722_v15  ;;  %v293_v29 = vmul.f32 %v1769_v20, %v1712_v13  ;;  %v309_v30 = vmul.f32 %v1776_v21, %v1709_v12 }
  0x2a   : > { %v295_v32 = vmul.f32 %v1769_v20, %v1722_v15  ;;  %v311_v33 = vmul.f32 %v1776_v21, %v1719_v14  ;;  %v321_v34 = vadd.f32 %v305_v61, %v289_v60  ;;  %v337_v35 = vmul.f32 %v1791_v25, %v1702_v11 }
  0x2b   : > { %451 = vrot.lane.b32.xlu1 %v1709_v12, %s1598_s20  ;;  %449 = vrot.lane.b32.xlu0 %v1712_v13, %s1598_s20  ;;  %v369_v36 = vmul.f32 %v1806_v31, %v1699_v10  ;;  %v324_v37 = vadd.f32 %v308_v23, %v292_v22  ;;  %v340_v38 = vmul.f32 %v1791_v25, %v1709_v12 }
  0x2c   : > { %v296_v41 = vmul.f32 %v1769_v20, %v1719_v14  ;;  %v312_v42 = vmul.f32 %v1776_v21, %v1732_v17  ;;  %v323_v47 = vadd.f32 %v307_v26, %v291_v24  ;;  %v339_v48 = vmul.f32 %v1791_v25, %v1712_v13 }
  0x2d   : > { %v326_v49 = vadd.f32 %v310_v28, %v294_v27  ;;  %v342_v50 = vmul.f32 %v1791_v25, %v1719_v14  ;;  %v325_v60 = vadd.f32 %v309_v30, %v293_v29  ;;  %v341_v61 = vmul.f32 %v1791_v25, %v1722_v15 }
  0x2e   : > { %v327_v22 = vadd.f32 %v311_v33, %v295_v32  ;;  %v343_v23 = vmul.f32 %v1791_v25, %v1732_v17  ;;  %v354_v20 = vadd.f32 %v338_v57, %v322_v63  ;;  %v353_v21 = vadd.f32 %v337_v35, %v321_v34 }
  0x2f   : > { %455 = vrot.lane.b32.xlu1 %v1719_v14, %s1598_s20  ;;  %453 = vrot.lane.b32.xlu0 %v1722_v15, %s1598_s20  ;;  %v401_v24 = vmul.f32 %v1831_v44, %v1712_v13  ;;  %v356_v26 = vadd.f32 %v340_v38, %v324_v37  ;;  %v372_v27 = vmul.f32 %v1806_v31, %v1722_v15 }
  0x30   : > { %v328_v28 = vadd.f32 %v312_v42, %v296_v41  ;;  %v344_v29 = vmul.f32 %v1791_v25, %v1729_v16  ;;  %v355_v30 = vadd.f32 %v339_v48, %v323_v47  ;;  %v371_v32 = vmul.f32 %v1806_v31, %v1709_v12  ;;  %v2008_v42 = vld [vmem:[%s2885_s1 + $0x8] sm:$0xff] }
  0x31   : > { %v358_v33 = vadd.f32 %v342_v50, %v326_v49  ;;  %v374_v57 = vmul.f32 %v1806_v31, %v1732_v17  ;;  %v357_v63 = vadd.f32 %v341_v61, %v325_v60  ;;  %v373_v34 = vmul.f32 %v1806_v31, %v1719_v14 }
  0x32   : > { %v359_v35 = vadd.f32 %v343_v23, %v327_v22  ;;  %v375_v37 = vmul.f32 %v1806_v31, %v1729_v16  ;;  %v386_v25 = vadd.f32 %v370_v58, %v354_v20  ;;  %v385_v38 = vadd.f32 %v369_v36, %v353_v21 }
  0x33   : > { %459 = vrot.lane.b32.xlu1 %v1729_v16, %s1598_s20  ;;  %457 = vrot.lane.b32.xlu0 %v1732_v17, %s1598_s20  ;;  %v404_v41 = vmul.f32 %v1831_v44, %v1719_v14  ;;  %v388_v47 = vadd.f32 %v372_v27, %v356_v26  ;;  %v403_v48 = vmul.f32 %v1831_v44, %v1722_v15 }
  0x34   : > { %v360_v49 = vadd.f32 %v344_v29, %v328_v28  ;;  %v376_v50 = vmul.f32 %v1806_v31, %v1742_v19  ;;  %v387_v58 = vadd.f32 %v371_v32, %v355_v30  ;;  %v390_v36 = vadd.f32 %v374_v57, %v358_v33  ;;  %v2043_v57 = vld [vmem:[%s2885_s1 + $0x30] sm:$0xff] }
  0x35   : > { %v406_v22 = vmul.f32 %v1831_v44, %v1729_v16  ;;  %v405_v23 = vmul.f32 %v1831_v44, %v1732_v17  ;;  %v389_v21 = vadd.f32 %v373_v34, %v357_v63  ;;  %v391_v26 = vadd.f32 %v375_v37, %v359_v35 }
  0x36   : > { %v407_v27 = vmul.f32 %v1831_v44, %v1742_v19  ;;  %v413_v31 = vadd.f32 %v1897_v46, %v1909_v53  ;;  %v2030_v29 = vadd.f32 %v1913_v54, %v1915_v55  ;;  %v2035_v44 = vadd.f32 %v1919_v56, %v1937_v62  ;;  %v2048_v46 = vld [vmem:[%s2885_s1 + $0x58] sm:$0xff] }
  0x37   : > { %463 = vrot.lane.b32.xlu1 %v1739_v18, %s1598_s20  ;;  %461 = vrot.lane.b32.xlu0 %v1742_v19, %s1598_s20  ;;  %v2038_v32 = vadd.f32 %v1931_v59, %v386_v25  ;;  %v392_v33 = vadd.f32 %v376_v50, %v360_v49  ;;  %v2050_v54 = vadd.f32 %v401_v24, %v385_v38  ;;  %v2068_v24 = vld [vmem:[%s2885_s1 + $0x80] sm:$0xff] }
  0x38   : > { %v2052_v55 = vadd.f32 %v404_v41, %v388_v47  ;;  %v2054_v56 = vadd.f32 %v403_v48, %v387_v58  ;;  %v2056_v59 = vadd.f32 %v406_v22, %v390_v36  ;;  %v2060_v34 = vadd.f32 %v405_v23, %v389_v21 }
  0x39   : > { %v2062_v35 = vadd.f32 %v407_v27, %v391_v26  ;;  %v2079_v48 = vadd.f32 %v1881_v39, %v392_v33 }
  0x3b   : > { %627 = vrot.lane.b32.xlu1 %v1662_v3, %s1599_s21  ;;  %625 = vrot.lane.b32.xlu0 %v1652_v1, %s1599_s21 }
  0x3f   : > { %631 = vrot.lane.b32.xlu1 %v1659_v2, %s1599_s21  ;;  %629 = vrot.lane.b32.xlu0 %v1649_v0, %s1599_s21 }
  0x43   : > { %635 = vrot.lane.b32.xlu1 %v1669_v4, %s1599_s21  ;;  %633 = vrot.lane.b32.xlu0 %v1672_v5, %s1599_s21 }
  0x47   : > { %639 = vrot.lane.b32.xlu1 %v1679_v6, %s1599_s21  ;;  %637 = vrot.lane.b32.xlu0 %v1682_v7, %s1599_s21 }
  0x4b   : > { %643 = vrot.lane.b32.xlu1 %v1689_v8, %s1599_s21  ;;  %641 = vrot.lane.b32.xlu0 %v1692_v9, %s1599_s21 }
  0x4f   : > { %647 = vrot.lane.b32.xlu1 %v1699_v10, %s1599_s21  ;;  %645 = vrot.lane.b32.xlu0 %v1702_v11, %s1599_s21 }
  0x53   : > { %651 = vrot.lane.b32.xlu1 %v1709_v12, %s1599_s21  ;;  %649 = vrot.lane.b32.xlu0 %v1712_v13, %s1599_s21 }
  0x57   : > { %655 = vrot.lane.b32.xlu1 %v1719_v14, %s1599_s21  ;;  %653 = vrot.lane.b32.xlu0 %v1722_v15, %s1599_s21 }
  0x5b   : > { %659 = vrot.lane.b32.xlu1 %v1729_v16, %s1599_s21  ;;  %657 = vrot.lane.b32.xlu0 %v1732_v17, %s1599_s21 }
  0x5f   : > { %663 = vrot.lane.b32.xlu1 %v1739_v18, %s1599_s21  ;;  %661 = vrot.lane.b32.xlu0 %v1742_v19, %s1599_s21 }
  0x63   : > { %827 = vrot.lane.b32.xlu1 %v1662_v3, %s1600_s26  ;;  %825 = vrot.lane.b32.xlu0 %v1652_v1, %s1600_s26 }
  0x67   : > { %831 = vrot.lane.b32.xlu1 %v1659_v2, %s1600_s26  ;;  %829 = vrot.lane.b32.xlu0 %v1649_v0, %s1600_s26 }
  0x6b   : > { %835 = vrot.lane.b32.xlu1 %v1669_v4, %s1600_s26  ;;  %833 = vrot.lane.b32.xlu0 %v1672_v5, %s1600_s26 }
  0x6f   : > { %839 = vrot.lane.b32.xlu1 %v1679_v6, %s1600_s26  ;;  %837 = vrot.lane.b32.xlu0 %v1682_v7, %s1600_s26 }
  0x73   : > { %843 = vrot.lane.b32.xlu1 %v1689_v8, %s1600_s26  ;;  %841 = vrot.lane.b32.xlu0 %v1692_v9, %s1600_s26 }
  0x77   : > { %847 = vrot.lane.b32.xlu1 %v1699_v10, %s1600_s26  ;;  %845 = vrot.lane.b32.xlu0 %v1702_v11, %s1600_s26 }
  0x7b   : > { %851 = vrot.lane.b32.xlu1 %v1709_v12, %s1600_s26  ;;  %849 = vrot.lane.b32.xlu0 %v1712_v13, %s1600_s26 }
  0x7f   : > { %855 = vrot.lane.b32.xlu1 %v1719_v14, %s1600_s26  ;;  %853 = vrot.lane.b32.xlu0 %v1722_v15, %s1600_s26 }
  0x83   : > { %859 = vrot.lane.b32.xlu1 %v1729_v16, %s1600_s26  ;;  %857 = vrot.lane.b32.xlu0 %v1732_v17, %s1600_s26 }
  0x85   : > { %v430_v60 = vpop.permute.xlu1 %429  ;;  %v426_v61 = vpop.permute.xlu0 %425 }
  0x86   : > { %v467_v20 = vmul.f32 %v430_v60, %v2008_v42  ;;  %v465_v28 = vmul.f32 %v426_v61, %v2008_v42  ;;  %v498_v41 = vmul.f32 %v430_v60, %v2043_v57 }
  0x87   : > { %863 = vrot.lane.b32.xlu1 %v1739_v18, %s1600_s26  ;;  %861 = vrot.lane.b32.xlu0 %v1742_v19, %s1600_s26 }
  0x88   : > { %v483_v30 = vadd.f32 %v467_v20, %v1883_v40  ;;  %v481_v37 = vadd.f32 %v465_v28, %v1891_v43  ;;  %v529_v43 = vmul.f32 %v430_v60, %v2048_v46 }
  0x89   : > { %v432_v53 = vpop.permute.xlu1 %431  ;;  %v428_v40 = vpop.permute.xlu0 %427 }
  0x8a   : > { %v468_v62 = vmul.f32 %v432_v53, %v2008_v42  ;;  %v499_v63 = vmul.f32 %v432_v53, %v2043_v57  ;;  %v466_v25 = vmul.f32 %v428_v40, %v2008_v42  ;;  %v497_v38 = vmul.f32 %v428_v40, %v2043_v57 }
  0x8b   : > { %1027 = vrot.lane.b32.xlu1 %v1662_v3, %s1601_s18  ;;  %1025 = vrot.lane.b32.xlu0 %v1652_v1, %s1601_s18  ;;  %v530_v50 = vmul.f32 %v432_v53, %v2048_v46  ;;  %v561_v22 = vmul.f32 %v432_v53, %v2068_v24 }
  0x8c   : > { %v515_v47 = vadd.f32 %v499_v63, %v483_v30  ;;  %v484_v49 = vadd.f32 %v468_v62, %v1893_v45  ;;  %v482_v61 = vadd.f32 %v466_v25, %v1905_v51  ;;  %v513_v58 = vadd.f32 %v497_v38, %v481_v37  ;;  %v2095_v51 = vld [vmem:[%s2885_s1 + $0xa8] sm:$0xff] }
  0x8d   : > { %v436_v36 = vpop.permute.xlu1 %435  ;;  %v434_v3 = vpop.permute.xlu0 %433 }
  0x8e   : > { %v470_v1 = vmul.f32 %v436_v36, %v2008_v42  ;;  %v501_v23 = vmul.f32 %v436_v36, %v2043_v57  ;;  %v532_v60 = vmul.f32 %v436_v36, %v2048_v46  ;;  %v514_v20 = vadd.f32 %v498_v41, %v482_v61 }
  0x8f   : > { %v545_v39 = vadd.f32 %v529_v43, %v513_v58  ;;  %v469_v21 = vmul.f32 %v434_v3, %v2008_v42  ;;  %v500_v45 = vmul.f32 %v434_v3, %v2043_v57  ;;  %1031 = vrot.lane.b32.xlu1 %v1659_v2, %s1601_s18  ;;  %v2099_v27 = vmul.f32 %v436_v36, %v2068_v24 }
  0x90   : > { %v486_v26 = vadd.f32 %v470_v1, %v1907_v52  ;;  %v531_v28 = vmul.f32 %v434_v3, %v2048_v46  ;;  %v562_v30 = vmul.f32 %v434_v3, %v2068_v24  ;;  %1029 = vrot.lane.b32.xlu0 %v1649_v0, %s1601_s18  ;;  %v546_v33 = vadd.f32 %v530_v50, %v514_v20 }
  0x91   : > { %v485_v53 = vadd.f32 %v469_v21, %v413_v31  ;;  %v516_v2 = vadd.f32 %v500_v45, %v484_v49  ;;  %v440_v40 = vpop.permute.xlu1 %439  ;;  %v438_v62 = vpop.permute.xlu0 %437  ;;  %v2106_v63 = vmul.f32 %v436_v36, %v2095_v51  ;;  %v2113_v38 = vmul.f32 %v434_v3, %v2095_v51 }
  0x92   : > { %v2108_v37 = vadd.f32 %v531_v28, %v515_v47  ;;  %v472_v52 = vmul.f32 %v440_v40, %v2008_v42  ;;  %v503_v25 = vmul.f32 %v440_v40, %v2043_v57  ;;  %v534_v41 = vmul.f32 %v440_v40, %v2048_v46 }
  0x93   : > { %v565_v0 = vmul.f32 %v440_v40, %v2068_v24  ;;  %v517_v31 = vadd.f32 %v501_v23, %v485_v53  ;;  %v548_v43 = vadd.f32 %v532_v60, %v516_v2  ;;  %1035 = vrot.lane.b32.xlu1 %v1669_v4, %s1601_s18  ;;  %v2120_v49 = vmul.f32 %v440_v40, %v2095_v51 }
  0x94   : > { %v471_v47 = vmul.f32 %v438_v62, %v2008_v42  ;;  %v502_v50 = vmul.f32 %v438_v62, %v2043_v57  ;;  %v533_v61 = vmul.f32 %v438_v62, %v2048_v46  ;;  %1033 = vrot.lane.b32.xlu0 %v1672_v5, %s1601_s18  ;;  %v488_v58 = vadd.f32 %v472_v52, %v2030_v29 }
  0x95   : > { %v564_v36 = vmul.f32 %v438_v62, %v2068_v24  ;;  %v444_v3 = vpop.permute.xlu1 %443  ;;  %v442_v1 = vpop.permute.xlu0 %441  ;;  %v2129_v23 = vadd.f32 %v562_v30, %v546_v33  ;;  %v2131_v4 = vadd.f32 %v561_v22, %v545_v39  ;;  %v2138_v5 = vmul.f32 %v438_v62, %v2095_v51 }
  0x96   : > { %v487_v60 = vadd.f32 %v471_v47, %v2035_v44  ;;  %v518_v20 = vadd.f32 %v502_v50, %v486_v26  ;;  %v549_v21 = vadd.f32 %v533_v61, %v517_v31  ;;  %v474_v45 = vmul.f32 %v444_v3, %v2008_v42 }
  0x97   : > { %v2135_v28 = vadd.f32 %v564_v36, %v548_v43  ;;  %v505_v29 = vmul.f32 %v444_v3, %v2043_v57  ;;  %v536_v53 = vmul.f32 %v444_v3, %v2048_v46  ;;  %1039 = vrot.lane.b32.xlu1 %v1679_v6, %s1601_s18  ;;  %v567_v44 = vmul.f32 %v444_v3, %v2068_v24 }
  0x98   : > { %v490_v22 = vadd.f32 %v474_v45, %v2038_v32  ;;  %v519_v39 = vadd.f32 %v503_v25, %v487_v60  ;;  %v550_v26 = vadd.f32 %v534_v41, %v518_v20  ;;  %1037 = vrot.lane.b32.xlu0 %v1682_v7, %s1601_s18  ;;  %v581_v30 = vadd.f32 %v565_v0, %v549_v21 }
  0x99   : > { %v473_v33 = vmul.f32 %v442_v1, %v2008_v42  ;;  %v504_v2 = vmul.f32 %v442_v1, %v2043_v57  ;;  %v535_v40 = vmul.f32 %v442_v1, %v2048_v46  ;;  %v448_v62 = vpop.permute.xlu1 %447  ;;  %v446_v52 = vpop.permute.xlu0 %445  ;;  %v2152_v6 = vmul.f32 %v444_v3, %v2095_v51 }
  0x9a   : > { %v566_v32 = vmul.f32 %v442_v1, %v2068_v24  ;;  %v597_v25 = vmul.f32 %v442_v1, %v2095_v51  ;;  %v476_v41 = vmul.f32 %v448_v62, %v2008_v42  ;;  %v507_v43 = vmul.f32 %v448_v62, %v2043_v57 }
  0x9b   : > { %v489_v7 = vadd.f32 %v473_v33, %v2050_v54  ;;  %v520_v0 = vadd.f32 %v504_v2, %v488_v58  ;;  %v551_v31 = vadd.f32 %v535_v40, %v519_v39  ;;  %1043 = vrot.lane.b32.xlu1 %v1689_v8, %s1601_s18  ;;  %v538_v36 = vmul.f32 %v448_v62, %v2048_v46 }
  0x9c   : > { %v2161_v47 = vadd.f32 %v566_v32, %v550_v26  ;;  %v2163_v50 = vadd.f32 %v597_v25, %v581_v30  ;;  %v492_v61 = vadd.f32 %v476_v41, %v2052_v55  ;;  %1041 = vrot.lane.b32.xlu0 %v1692_v9, %s1601_s18  ;;  %v569_v54 = vmul.f32 %v448_v62, %v2068_v24 }
  0x9d   : > { %v521_v58 = vadd.f32 %v505_v29, %v489_v7  ;;  %v552_v3 = vadd.f32 %v536_v53, %v520_v0  ;;  %v583_v1 = vadd.f32 %v567_v44, %v551_v31  ;;  %v452_v60 = vpop.permute.xlu1 %451  ;;  %v450_v20 = vpop.permute.xlu0 %449  ;;  %v475_v8 = vmul.f32 %v446_v52, %v2008_v42 }
  0x9e   : > { %v506_v21 = vmul.f32 %v446_v52, %v2043_v57  ;;  %v537_v45 = vmul.f32 %v446_v52, %v2048_v46  ;;  %v568_v55 = vmul.f32 %v446_v52, %v2068_v24  ;;  %v2175_v39 = vmul.f32 %v448_v62, %v2095_v51 }
  0x9f   : > { %v599_v9 = vmul.f32 %v446_v52, %v2095_v51  ;;  %v478_v26 = vmul.f32 %v452_v60, %v2008_v42  ;;  %v509_v29 = vmul.f32 %v452_v60, %v2043_v57  ;;  %1047 = vrot.lane.b32.xlu1 %v1699_v10, %s1601_s18  ;;  %v491_v53 = vadd.f32 %v475_v8, %v2054_v56 }
  0xa0   : > { %v522_v44 = vadd.f32 %v506_v21, %v490_v22  ;;  %v553_v30 = vadd.f32 %v537_v45, %v521_v58  ;;  %v2183_v33 = vadd.f32 %v568_v55, %v552_v3  ;;  %1045 = vrot.lane.b32.xlu0 %v1702_v11, %s1601_s18  ;;  %v540_v62 = vmul.f32 %v452_v60, %v2048_v46 }
  0xa1   : > { %v2187_v2 = vadd.f32 %v599_v9, %v583_v1  ;;  %v494_v40 = vadd.f32 %v478_v26, %v2056_v59  ;;  %v571_v52 = vmul.f32 %v452_v60, %v2068_v24  ;;  %v456_v32 = vpop.permute.xlu1 %455  ;;  %v454_v25 = vpop.permute.xlu0 %453  ;;  %v523_v10 = vadd.f32 %v507_v43, %v491_v53 }
  0xa2   : > { %v554_v41 = vadd.f32 %v538_v36, %v522_v44  ;;  %v585_v56 = vadd.f32 %v569_v54, %v553_v30  ;;  %v477_v22 = vmul.f32 %v450_v20, %v2008_v42  ;;  %v508_v7 = vmul.f32 %v450_v20, %v2043_v57 }
  0xa3   : > { %v539_v0 = vmul.f32 %v450_v20, %v2048_v46  ;;  %v570_v11 = vmul.f32 %v450_v20, %v2068_v24  ;;  %v601_v31 = vmul.f32 %v450_v20, %v2095_v51  ;;  %1051 = vrot.lane.b32.xlu1 %v1709_v12, %s1601_s18  ;;  %v2200_v59 = vmul.f32 %v452_v60, %v2095_v51 }
  0xa4   : > { %v493_v43 = vadd.f32 %v477_v22, %v2060_v34  ;;  %v480_v36 = vmul.f32 %v456_v32, %v2008_v42  ;;  %v511_v54 = vmul.f32 %v456_v32, %v2043_v57  ;;  %1049 = vrot.lane.b32.xlu0 %v1712_v13, %s1601_s18  ;;  %v524_v58 = vadd.f32 %v508_v7, %v492_v61 }
  0xa5   : > { %v555_v3 = vadd.f32 %v539_v0, %v523_v10  ;;  %v2207_v1 = vadd.f32 %v570_v11, %v554_v41  ;;  %v2209_v20 = vadd.f32 %v601_v31, %v585_v56  ;;  %v460_v8 = vpop.permute.xlu1 %459  ;;  %v458_v12 = vpop.permute.xlu0 %457  ;;  %v542_v60 = vmul.f32 %v456_v32, %v2048_v46 }
  0xa6   : > { %v573_v21 = vmul.f32 %v456_v32, %v2068_v24  ;;  %v525_v34 = vadd.f32 %v509_v29, %v493_v43  ;;  %v479_v45 = vmul.f32 %v454_v25, %v2008_v42  ;;  %v556_v55 = vadd.f32 %v540_v62, %v524_v58 }
  0xa7   : > { %v587_v9 = vadd.f32 %v571_v52, %v555_v3  ;;  %v510_v26 = vmul.f32 %v454_v25, %v2043_v57  ;;  %v541_v13 = vmul.f32 %v454_v25, %v2048_v46  ;;  %1055 = vrot.lane.b32.xlu1 %v1719_v14, %s1601_s18  ;;  %v2219_v61 = vmul.f32 %v456_v32, %v2095_v51 }
  0xa8   : > { %v495_v53 = vadd.f32 %v479_v45, %v2062_v35  ;;  %v572_v44 = vmul.f32 %v454_v25, %v2068_v24  ;;  %v603_v29 = vmul.f32 %v454_v25, %v2095_v51  ;;  %1053 = vrot.lane.b32.xlu0 %v1722_v15, %s1601_s18  ;;  %v544_v62 = vmul.f32 %v460_v8, %v2048_v46 }
  0xa9   : > { %v526_v42 = vadd.f32 %v510_v26, %v494_v40  ;;  %v557_v30 = vadd.f32 %v541_v13, %v525_v34  ;;  %v606_v52 = vmul.f32 %v460_v8, %v2095_v51  ;;  %v464_v10 = vpop.permute.xlu1 %463  ;;  %v462_v14 = vpop.permute.xlu0 %461  ;;  %v512_v35 = vmul.f32 %v458_v12, %v2043_v57  ;;  %v2239_v40 = vld [vmem:[%s2885_s1 + $0x10] sm:$0xff]  ;;  %v2244_v57 = vld [vmem:[%s2885_s1 + $0x38] sm:$0xff] }
  0xaa   : > { %v588_v41 = vadd.f32 %v572_v44, %v556_v55  ;;  %v2228_v32 = vadd.f32 %v603_v29, %v587_v9  ;;  %v543_v56 = vmul.f32 %v458_v12, %v2048_v46  ;;  %v574_v7 = vmul.f32 %v458_v12, %v2068_v24 }
  0xab   : > { %v558_v22 = vadd.f32 %v542_v60, %v526_v42  ;;  %v589_v25 = vadd.f32 %v573_v21, %v557_v30  ;;  %v605_v15 = vmul.f32 %v458_v12, %v2095_v51  ;;  %1059 = vrot.lane.b32.xlu1 %v1729_v16, %s1601_s18  ;;  %v575_v46 = vmul.f32 %v460_v8, %v2068_v24 }
  0xac   : > { %v496_v0 = vadd.f32 %v480_v36, %v2079_v48  ;;  %v527_v11 = vadd.f32 %v511_v54, %v495_v53  ;;  %v576_v31 = vmul.f32 %v462_v14, %v2068_v24  ;;  %1057 = vrot.lane.b32.xlu0 %v1732_v17, %s1601_s18  ;;  %v607_v58 = vmul.f32 %v462_v14, %v2095_v51 }
  0xad   : > { %v590_v16 = vadd.f32 %v574_v7, %v558_v22  ;;  %v2251_v43 = vadd.f32 %v605_v15, %v589_v25  ;;  %v628_v3 = vpop.permute.xlu1 %627  ;;  %v610_v12 = vadd.f32 %v2106_v63, %v2129_v23  ;;  %v626_v60 = vpop.permute.xlu0 %625  ;;  %v609_v17 = vadd.f32 %v2113_v38, %v2131_v4 }
  0xae   : > { %v528_v21 = vadd.f32 %v512_v35, %v496_v0  ;;  %v559_v8 = vadd.f32 %v543_v56, %v527_v11  ;;  %v666_v48 = vmul.f32 %v628_v3, %v2239_v40  ;;  %v697_v36 = vmul.f32 %v628_v3, %v2244_v57  ;;  %v2324_v0 = vld [vmem:[%s2885_s1 + $0xb0] sm:$0xff] }
  0xaf   : > { %v2258_v24 = vadd.f32 %v606_v52, %v590_v16  ;;  %v665_v54 = vmul.f32 %v626_v60, %v2239_v40  ;;  %1063 = vrot.lane.b32.xlu1 %v1739_v18, %s1601_s18  ;;  %v612_v63 = vadd.f32 %v2120_v49, %v2135_v28  ;;  %v608_v23 = vmul.f32 %v464_v10, %v2095_v51 }
  0xb0   : > { %v560_v34 = vadd.f32 %v544_v62, %v528_v21  ;;  %v591_v45 = vadd.f32 %v575_v46, %v559_v8  ;;  %1061 = vrot.lane.b32.xlu0 %v1742_v19, %s1601_s18  ;;  %v579_v55 = vadd.f32 %v2099_v27, %v2108_v37  ;;  %v614_v26 = vadd.f32 %v2152_v6, %v2161_v47  ;;  %v2285_v19 = vld [vmem:[%s2885_s1 + $0x60] sm:$0xff]  ;;  %v2290_v27 = vld [vmem:[%s2885_s1 + $0x88] sm:$0xff] }
  0xb1   : > { %v681_v9 = vadd.f32 %v665_v54, %v609_v17  ;;  %v632_v38 = vpop.permute.xlu1 %631  ;;  %v630_v4 = vpop.permute.xlu0 %629  ;;  %v616_v18 = vadd.f32 %v2175_v39, %v2183_v33  ;;  %v2278_v51 = vadd.f32 %v2200_v59, %v2207_v1  ;;  %v682_v6 = vadd.f32 %v666_v48, %v610_v12 }
  0xb2   : > { %v592_v49 = vadd.f32 %v576_v31, %v560_v34  ;;  %v2280_v28 = vadd.f32 %v607_v58, %v591_v45  ;;  %v668_v37 = vmul.f32 %v632_v38, %v2239_v40  ;;  %v699_v39 = vmul.f32 %v632_v38, %v2244_v57 }
  0xb3   : > { %v713_v47 = vadd.f32 %v697_v36, %v681_v9  ;;  %v611_v33 = vadd.f32 %v2138_v5, %v579_v55  ;;  %v730_v1 = vmul.f32 %v632_v38, %v2285_v19  ;;  %v667_v13 = vmul.f32 %v630_v4, %v2239_v40 }
  0xb4   : > { %v2295_v59 = vadd.f32 %v608_v23, %v592_v49  ;;  %v698_v53 = vmul.f32 %v630_v4, %v2244_v57  ;;  %v684_v44 = vadd.f32 %v668_v37, %v612_v63  ;;  %v2301_v29 = vmul.f32 %v632_v38, %v2290_v27 }
  0xb5   : > { %v729_v42 = vmul.f32 %v630_v4, %v2285_v19  ;;  %v636_v30 = vpop.permute.xlu1 %635  ;;  %v2304_v62 = vpop.permute.xlu0 %633  ;;  %v2307_v52 = vadd.f32 %v2219_v61, %v588_v41  ;;  %v683_v5 = vadd.f32 %v667_v13, %v611_v33 }
  0xb6   : > { %v714_v10 = vadd.f32 %v698_v53, %v682_v6  ;;  %v670_v14 = vmul.f32 %v636_v30, %v2239_v40  ;;  %v701_v35 = vmul.f32 %v636_v30, %v2244_v57  ;;  %v732_v22 = vmul.f32 %v636_v30, %v2285_v19 }
  0xb7   : > { %v2311_v56 = vadd.f32 %v729_v42, %v713_v47  ;;  %v2315_v25 = vmul.f32 %v636_v30, %v2290_v27  ;;  %v669_v7 = vmul.f32 %v2304_v62, %v2239_v40  ;;  %v715_v15 = vadd.f32 %v699_v39, %v683_v5 }
  0xb8   : > { %v746_v46 = vadd.f32 %v730_v1, %v714_v10  ;;  %v686_v61 = vadd.f32 %v670_v14, %v614_v26  ;;  %v700_v41 = vmul.f32 %v2304_v62, %v2244_v57  ;;  %v731_v31 = vmul.f32 %v2304_v62, %v2285_v19 }
  0xb9   : > { %v685_v11 = vadd.f32 %v669_v7, %v2163_v50  ;;  %v762_v16 = vmul.f32 %v2304_v62, %v2290_v27  ;;  %v640_v58 = vpop.permute.xlu1 %639  ;;  %v638_v3 = vpop.permute.xlu0 %637  ;;  %v2332_v12 = vmul.f32 %v636_v30, %v2324_v0 }
  0xba   : > { %v716_v60 = vadd.f32 %v700_v41, %v684_v44  ;;  %v672_v21 = vmul.f32 %v640_v58, %v2239_v40  ;;  %v703_v8 = vmul.f32 %v640_v58, %v2244_v57  ;;  %v734_v48 = vmul.f32 %v640_v58, %v2285_v19 }
  0xbb   : > { %v2337_v36 = vadd.f32 %v731_v31, %v715_v15  ;;  %v765_v50 = vmul.f32 %v640_v58, %v2290_v27  ;;  %v2341_v17 = vmul.f32 %v640_v58, %v2324_v0  ;;  %v717_v54 = vadd.f32 %v701_v35, %v685_v11 }
  0xbc   : > { %v688_v63 = vadd.f32 %v672_v21, %v616_v18  ;;  %v748_v23 = vadd.f32 %v732_v22, %v716_v60  ;;  %v671_v34 = vmul.f32 %v638_v3, %v2239_v40  ;;  %v702_v45 = vmul.f32 %v638_v3, %v2244_v57 }
  0xbd   : > { %v733_v55 = vmul.f32 %v638_v3, %v2285_v19  ;;  %v764_v9 = vmul.f32 %v638_v3, %v2290_v27  ;;  %v2348_v38 = vmul.f32 %v638_v3, %v2324_v0  ;;  %v644_v4 = vpop.permute.xlu1 %643  ;;  %v642_v26 = vpop.permute.xlu0 %641  ;;  %v2350_v49 = vadd.f32 %v762_v16, %v746_v46 }
  0xbe   : > { %v687_v37 = vadd.f32 %v671_v34, %v2187_v2  ;;  %v718_v6 = vadd.f32 %v702_v45, %v686_v61  ;;  %v674_v18 = vmul.f32 %v644_v4, %v2239_v40  ;;  %v705_v47 = vmul.f32 %v644_v4, %v2244_v57 }
  0xbf   : > { %v749_v39 = vadd.f32 %v733_v55, %v717_v54  ;;  %v2355_v33 = vadd.f32 %v764_v9, %v748_v23  ;;  %v736_v1 = vmul.f32 %v644_v4, %v2285_v19  ;;  %v767_v13 = vmul.f32 %v644_v4, %v2290_v27 }
  0xc0   : > { %v690_v53 = vadd.f32 %v674_v18, %v2278_v51  ;;  %v2361_v44 = vmul.f32 %v644_v4, %v2324_v0  ;;  %v719_v42 = vadd.f32 %v703_v8, %v687_v37  ;;  %v750_v30 = vadd.f32 %v734_v48, %v718_v6 }
  0xc1   : > { %v781_v2 = vadd.f32 %v765_v50, %v749_v39  ;;  %v673_v5 = vmul.f32 %v642_v26, %v2239_v40  ;;  %v704_v10 = vmul.f32 %v642_v26, %v2244_v57  ;;  %v735_v14 = vmul.f32 %v642_v26, %v2285_v19  ;;  %v648_v35 = vpop.permute.xlu1 %647  ;;  %v646_v22 = vpop.permute.xlu0 %645 }
  0xc2   : > { %v766_v7 = vmul.f32 %v642_v26, %v2290_v27  ;;  %v797_v15 = vmul.f32 %v642_v26, %v2324_v0  ;;  %v676_v51 = vmul.f32 %v648_v35, %v2239_v40  ;;  %v707_v46 = vmul.f32 %v648_v35, %v2244_v57 }
  0xc3   : > { %v689_v61 = vadd.f32 %v673_v5, %v2209_v20  ;;  %v720_v41 = vadd.f32 %v704_v10, %v688_v63  ;;  %v751_v11 = vadd.f32 %v735_v14, %v719_v42  ;;  %v738_v31 = vmul.f32 %v648_v35, %v2285_v19 }
  0xc4   : > { %v2372_v16 = vadd.f32 %v766_v7, %v750_v30  ;;  %v2374_v58 = vadd.f32 %v797_v15, %v781_v2  ;;  %v692_v3 = vadd.f32 %v676_v51, %v2307_v52  ;;  %v769_v60 = vmul.f32 %v648_v35, %v2290_v27 }
  0xc5   : > { %v2379_v21 = vmul.f32 %v648_v35, %v2324_v0  ;;  %v721_v8 = vadd.f32 %v705_v47, %v689_v61  ;;  %v752_v48 = vadd.f32 %v736_v1, %v720_v41  ;;  %v783_v50 = vadd.f32 %v767_v13, %v751_v11  ;;  %v652_v54 = vpop.permute.xlu1 %651  ;;  %v650_v20 = vpop.permute.xlu0 %649 }
  0xc6   : > { %v675_v63 = vmul.f32 %v646_v22, %v2239_v40  ;;  %v706_v23 = vmul.f32 %v646_v22, %v2244_v57  ;;  %v737_v34 = vmul.f32 %v646_v22, %v2285_v19  ;;  %v768_v45 = vmul.f32 %v646_v22, %v2290_v27 }
  0xc7   : > { %v799_v52 = vmul.f32 %v646_v22, %v2324_v0  ;;  %v678_v55 = vmul.f32 %v652_v54, %v2239_v40  ;;  %v709_v9 = vmul.f32 %v652_v54, %v2244_v57  ;;  %v740_v4 = vmul.f32 %v652_v54, %v2285_v19 }
  0xc8   : > { %v691_v26 = vadd.f32 %v675_v63, %v2228_v32  ;;  %v722_v37 = vadd.f32 %v706_v23, %v690_v53  ;;  %v753_v6 = vadd.f32 %v737_v34, %v721_v8  ;;  %v2390_v18 = vadd.f32 %v768_v45, %v752_v48 }
  0xc9   : > { %v2392_v47 = vadd.f32 %v799_v52, %v783_v50  ;;  %v694_v39 = vadd.f32 %v678_v55, %v2258_v24  ;;  %v771_v1 = vmul.f32 %v652_v54, %v2290_v27  ;;  %v2397_v13 = vmul.f32 %v652_v54, %v2324_v0  ;;  %v656_v42 = vpop.permute.xlu1 %655  ;;  %v654_v30 = vpop.permute.xlu0 %653 }
  0xca   : > { %v723_v2 = vadd.f32 %v707_v46, %v691_v26  ;;  %v754_v5 = vadd.f32 %v738_v31, %v722_v37  ;;  %v785_v10 = vadd.f32 %v769_v60, %v753_v6  ;;  %v677_v32 = vmul.f32 %v650_v20, %v2239_v40 }
  0xcb   : > { %v708_v53 = vmul.f32 %v650_v20, %v2244_v57  ;;  %v739_v14 = vmul.f32 %v650_v20, %v2285_v19  ;;  %v770_v35 = vmul.f32 %v650_v20, %v2290_v27  ;;  %v801_v24 = vmul.f32 %v650_v20, %v2324_v0 }
  0xcc   : > { %v693_v22 = vadd.f32 %v677_v32, %v2251_v43  ;;  %v680_v7 = vmul.f32 %v656_v42, %v2239_v40  ;;  %v711_v15 = vmul.f32 %v656_v42, %v2244_v57  ;;  %v742_v51 = vmul.f32 %v656_v42, %v2285_v19  ;;  %v2439_v32 = vld [vmem:[%s2885_s1 + $0x40] sm:$0xff] }
  0xcd   : > { %v724_v46 = vadd.f32 %v708_v53, %v692_v3  ;;  %v755_v61 = vadd.f32 %v739_v14, %v723_v2  ;;  %v2408_v41 = vadd.f32 %v770_v35, %v754_v5  ;;  %v2410_v11 = vadd.f32 %v801_v24, %v785_v10  ;;  %v660_v31 = vpop.permute.xlu1 %659  ;;  %v658_v60 = vpop.permute.xlu0 %657  ;;  %v2434_v10 = vld [vmem:[%s2885_s1 + $0x18] sm:$0xff] }
  0xce   : > { %v773_v8 = vmul.f32 %v656_v42, %v2290_v27  ;;  %v2414_v48 = vmul.f32 %v656_v42, %v2324_v0  ;;  %v725_v43 = vadd.f32 %v709_v9, %v693_v22  ;;  %v679_v50 = vmul.f32 %v654_v30, %v2239_v40 }
  0xcf   : > { %v756_v54 = vadd.f32 %v740_v4, %v724_v46  ;;  %v787_v20 = vadd.f32 %v771_v1, %v755_v61  ;;  %v710_v63 = vmul.f32 %v654_v30, %v2244_v57  ;;  %v741_v3 = vmul.f32 %v654_v30, %v2285_v19 }
  0xd0   : > { %v695_v23 = vadd.f32 %v679_v50, %v2280_v28  ;;  %v772_v34 = vmul.f32 %v654_v30, %v2290_v27  ;;  %v803_v45 = vmul.f32 %v654_v30, %v2324_v0  ;;  %v744_v52 = vmul.f32 %v660_v31, %v2285_v19 }
  0xd1   : > { %v726_v55 = vadd.f32 %v710_v63, %v694_v39  ;;  %v757_v26 = vadd.f32 %v741_v3, %v725_v43  ;;  %v775_v9 = vmul.f32 %v660_v31, %v2290_v27  ;;  %v806_v40 = vmul.f32 %v660_v31, %v2324_v0  ;;  %v664_v4 = vpop.permute.xlu1 %663  ;;  %v662_v37 = vpop.permute.xlu0 %661 }
  0xd2   : > { %v788_v6 = vadd.f32 %v772_v34, %v756_v54  ;;  %v2425_v1 = vadd.f32 %v803_v45, %v787_v20  ;;  %v712_v42 = vmul.f32 %v658_v60, %v2244_v57  ;;  %v743_v28 = vmul.f32 %v658_v60, %v2285_v19  ;;  %v2476_v45 = vld [vmem:[%s2885_s1 + $0x68] sm:$0xff] }
  0xd3   : > { %v758_v2 = vadd.f32 %v742_v51, %v726_v55  ;;  %v789_v5 = vadd.f32 %v773_v8, %v757_v26  ;;  %v774_v30 = vmul.f32 %v658_v60, %v2290_v27  ;;  %v805_v39 = vmul.f32 %v658_v60, %v2324_v0 }
  0xd4   : > { %v808_v57 = vmul.f32 %v664_v4, %v2324_v0  ;;  %v696_v19 = vadd.f32 %v680_v7, %v2295_v59  ;;  %v727_v53 = vadd.f32 %v711_v15, %v695_v23  ;;  %v776_v14 = vmul.f32 %v662_v37, %v2290_v27 }
  0xd5   : > { %v790_v35 = vadd.f32 %v774_v30, %v758_v2  ;;  %v2444_v24 = vadd.f32 %v805_v39, %v789_v5  ;;  %v807_v22 = vmul.f32 %v662_v37, %v2324_v0  ;;  %v828_v51 = vpop.permute.xlu1 %827  ;;  %v810_v46 = vadd.f32 %v2332_v12, %v2350_v49  ;;  %v826_v61 = vpop.permute.xlu0 %825  ;;  %v2461_v49 = vld [vmem:[%s2885_s1 + $0x90] sm:$0xff] }
  0xd6   : > { %v728_v31 = vadd.f32 %v712_v42, %v696_v19  ;;  %v759_v60 = vadd.f32 %v743_v28, %v727_v53  ;;  %v866_v8 = vmul.f32 %v828_v51, %v2434_v10  ;;  %v897_v43 = vmul.f32 %v828_v51, %v2439_v32  ;;  %v2512_v53 = vld [vmem:[%s2885_s1 + $0xb8] sm:$0xff] }
  0xd7   : > { %v2451_v59 = vadd.f32 %v806_v40, %v790_v35  ;;  %v793_v27 = vmul.f32 %v2304_v62, %v2324_v0  ;;  %v777_v7 = vadd.f32 %v2301_v29, %v2311_v56  ;;  %v865_v15 = vmul.f32 %v826_v61, %v2434_v10 }
  0xd8   : > { %v760_v50 = vadd.f32 %v744_v52, %v728_v31  ;;  %v791_v54 = vadd.f32 %v775_v9, %v759_v60  ;;  %v882_v12 = vadd.f32 %v866_v8, %v810_v46  ;;  %v812_v20 = vadd.f32 %v2341_v17, %v2355_v33 }
  0xd9   : > { %v809_v63 = vadd.f32 %v793_v27, %v777_v7  ;;  %v832_v3 = vpop.permute.xlu1 %831  ;;  %v779_v62 = vadd.f32 %v2315_v25, %v2337_v36  ;;  %v830_v0 = vpop.permute.xlu0 %829  ;;  %v814_v29 = vadd.f32 %v2361_v44, %v2372_v16  ;;  %v816_v56 = vadd.f32 %v2379_v21, %v2390_v18 }
  0xda   : > { %v792_v23 = vadd.f32 %v776_v14, %v760_v50  ;;  %v2471_v34 = vadd.f32 %v807_v22, %v791_v54  ;;  %v868_v17 = vmul.f32 %v832_v3, %v2434_v10  ;;  %v899_v33 = vmul.f32 %v832_v3, %v2439_v32 }
  0xdb   : > { %v881_v25 = vadd.f32 %v865_v15, %v809_v63  ;;  %v930_v36 = vmul.f32 %v832_v3, %v2476_v45  ;;  %v2482_v44 = vmul.f32 %v832_v3, %v2461_v49  ;;  %v811_v16 = vadd.f32 %v2348_v38, %v779_v62 }
  0xdc   : > { %v2485_v21 = vadd.f32 %v808_v57, %v792_v23  ;;  %v884_v18 = vadd.f32 %v868_v17, %v812_v20  ;;  %v867_v52 = vmul.f32 %v830_v0, %v2434_v10  ;;  %v898_v55 = vmul.f32 %v830_v0, %v2439_v32 }
  0xdd   : > { %v913_v26 = vadd.f32 %v897_v43, %v881_v25  ;;  %v929_v9 = vmul.f32 %v830_v0, %v2476_v45  ;;  %v836_v40 = vpop.permute.xlu1 %835  ;;  %v2490_v4 = vpop.permute.xlu0 %833  ;;  %v818_v37 = vadd.f32 %v2397_v13, %v2408_v41  ;;  %v2495_v42 = vadd.f32 %v2414_v48, %v788_v6 }
  0xde   : > { %v883_v38 = vadd.f32 %v867_v52, %v811_v16  ;;  %v914_v28 = vadd.f32 %v898_v55, %v882_v12  ;;  %v870_v2 = vmul.f32 %v836_v40, %v2434_v10  ;;  %v901_v5 = vmul.f32 %v836_v40, %v2439_v32 }
  0xdf   : > { %v2499_v30 = vadd.f32 %v929_v9, %v913_v26  ;;  %v932_v39 = vmul.f32 %v836_v40, %v2476_v45  ;;  %v2503_v57 = vmul.f32 %v836_v40, %v2461_v49  ;;  %v869_v19 = vmul.f32 %v2490_v4, %v2434_v10 }
  0xe0   : > { %v915_v13 = vadd.f32 %v899_v33, %v883_v38  ;;  %v946_v41 = vadd.f32 %v930_v36, %v914_v28  ;;  %v886_v48 = vadd.f32 %v870_v2, %v814_v29  ;;  %v900_v6 = vmul.f32 %v2490_v4, %v2439_v32 }
  0xe1   : > { %v885_v14 = vadd.f32 %v869_v19, %v2374_v58  ;;  %v931_v35 = vmul.f32 %v2490_v4, %v2476_v45  ;;  %v962_v22 = vmul.f32 %v2490_v4, %v2461_v49  ;;  %v840_v51 = vpop.permute.xlu1 %839  ;;  %v838_v46 = vpop.permute.xlu0 %837  ;;  %v2520_v61 = vmul.f32 %v836_v40, %v2512_v53 }
  0xe2   : > { %v916_v31 = vadd.f32 %v900_v6, %v884_v18  ;;  %v872_v60 = vmul.f32 %v840_v51, %v2434_v10  ;;  %v903_v8 = vmul.f32 %v840_v51, %v2439_v32  ;;  %v934_v43 = vmul.f32 %v840_v51, %v2476_v45 }
  0xe3   : > { %v2525_v27 = vadd.f32 %v931_v35, %v915_v13  ;;  %v965_v58 = vmul.f32 %v840_v51, %v2461_v49  ;;  %v2529_v7 = vmul.f32 %v840_v51, %v2512_v53  ;;  %v917_v15 = vadd.f32 %v901_v5, %v885_v14 }
  0xe4   : > { %v888_v50 = vadd.f32 %v872_v60, %v816_v56  ;;  %v948_v54 = vadd.f32 %v932_v39, %v916_v31  ;;  %v871_v12 = vmul.f32 %v838_v46, %v2434_v10  ;;  %v902_v20 = vmul.f32 %v838_v46, %v2439_v32 }
  0xe5   : > { %v933_v63 = vmul.f32 %v838_v46, %v2476_v45  ;;  %v964_v3 = vmul.f32 %v838_v46, %v2461_v49  ;;  %v2536_v62 = vmul.f32 %v838_v46, %v2512_v53  ;;  %v844_v0 = vpop.permute.xlu1 %843  ;;  %v842_v29 = vpop.permute.xlu0 %841  ;;  %v2538_v23 = vadd.f32 %v962_v22, %v946_v41 }
  0xe6   : > { %v887_v17 = vadd.f32 %v871_v12, %v2392_v47  ;;  %v918_v33 = vadd.f32 %v902_v20, %v886_v48  ;;  %v874_v56 = vmul.f32 %v844_v0, %v2434_v10  ;;  %v905_v25 = vmul.f32 %v844_v0, %v2439_v32 }
  0xe7   : > { %v949_v36 = vadd.f32 %v933_v63, %v917_v15  ;;  %v2543_v16 = vadd.f32 %v964_v3, %v948_v54  ;;  %v936_v18 = vmul.f32 %v844_v0, %v2476_v45  ;;  %v967_v52 = vmul.f32 %v844_v0, %v2461_v49 }
  0xe8   : > { %v890_v55 = vadd.f32 %v874_v56, %v818_v37  ;;  %v2548_v26 = vmul.f32 %v844_v0, %v2512_v53  ;;  %v919_v9 = vadd.f32 %v903_v8, %v887_v17  ;;  %v950_v40 = vadd.f32 %v934_v43, %v918_v33 }
  0xe9   : > { %v981_v38 = vadd.f32 %v965_v58, %v949_v36  ;;  %v873_v47 = vmul.f32 %v842_v29, %v2434_v10  ;;  %v904_v28 = vmul.f32 %v842_v29, %v2439_v32  ;;  %v935_v2 = vmul.f32 %v842_v29, %v2476_v45  ;;  %v848_v5 = vpop.permute.xlu1 %847  ;;  %v846_v39 = vpop.permute.xlu0 %845 }
  0xea   : > { %v966_v19 = vmul.f32 %v842_v29, %v2461_v49  ;;  %v997_v13 = vmul.f32 %v842_v29, %v2512_v53  ;;  %v876_v37 = vmul.f32 %v848_v5, %v2434_v10  ;;  %v907_v41 = vmul.f32 %v848_v5, %v2439_v32 }
  0xeb   : > { %v889_v48 = vadd.f32 %v873_v47, %v2410_v11  ;;  %v920_v6 = vadd.f32 %v904_v28, %v888_v50  ;;  %v951_v14 = vadd.f32 %v935_v2, %v919_v9  ;;  %v938_v35 = vmul.f32 %v848_v5, %v2476_v45 }
  0xec   : > { %v2559_v22 = vadd.f32 %v966_v19, %v950_v40  ;;  %v2561_v51 = vadd.f32 %v997_v13, %v981_v38  ;;  %v892_v46 = vadd.f32 %v876_v37, %v2495_v42  ;;  %v969_v31 = vmul.f32 %v848_v5, %v2461_v49 }
  0xed   : > { %v2566_v60 = vmul.f32 %v848_v5, %v2512_v53  ;;  %v921_v8 = vadd.f32 %v905_v25, %v889_v48  ;;  %v952_v43 = vadd.f32 %v936_v18, %v920_v6  ;;  %v983_v58 = vadd.f32 %v967_v52, %v951_v14  ;;  %v852_v15 = vpop.permute.xlu1 %851  ;;  %v850_v11 = vpop.permute.xlu0 %849 }
  0xee   : > { %v875_v50 = vmul.f32 %v846_v39, %v2434_v10  ;;  %v906_v54 = vmul.f32 %v846_v39, %v2439_v32  ;;  %v937_v12 = vmul.f32 %v846_v39, %v2476_v45  ;;  %v968_v20 = vmul.f32 %v846_v39, %v2461_v49 }
  0xef   : > { %v999_v42 = vmul.f32 %v846_v39, %v2512_v53  ;;  %v878_v63 = vmul.f32 %v852_v15, %v2434_v10  ;;  %v909_v3 = vmul.f32 %v852_v15, %v2439_v32  ;;  %v940_v0 = vmul.f32 %v852_v15, %v2476_v45 }
  0xf0   : > { %v891_v29 = vadd.f32 %v875_v50, %v2425_v1  ;;  %v922_v17 = vadd.f32 %v906_v54, %v890_v55  ;;  %v953_v33 = vadd.f32 %v937_v12, %v921_v8  ;;  %v2577_v56 = vadd.f32 %v968_v20, %v952_v43 }
  0xf1   : > { %v2579_v25 = vadd.f32 %v999_v42, %v983_v58  ;;  %v894_v36 = vadd.f32 %v878_v63, %v2451_v59  ;;  %v971_v18 = vmul.f32 %v852_v15, %v2461_v49  ;;  %v2584_v52 = vmul.f32 %v852_v15, %v2512_v53  ;;  %v856_v9 = vpop.permute.xlu1 %855  ;;  %v854_v40 = vpop.permute.xlu0 %853 }
  0xf2   : > { %v923_v38 = vadd.f32 %v907_v41, %v891_v29  ;;  %v954_v47 = vadd.f32 %v938_v35, %v922_v17  ;;  %v985_v28 = vadd.f32 %v969_v31, %v953_v33  ;;  %v877_v1 = vmul.f32 %v850_v11, %v2434_v10 }
  0xf3   : > { %v908_v55 = vmul.f32 %v850_v11, %v2439_v32  ;;  %v939_v2 = vmul.f32 %v850_v11, %v2476_v45  ;;  %v970_v5 = vmul.f32 %v850_v11, %v2461_v49  ;;  %v1001_v59 = vmul.f32 %v850_v11, %v2512_v53 }
  0xf4   : > { %v893_v39 = vadd.f32 %v877_v1, %v2444_v24  ;;  %v880_v19 = vmul.f32 %v856_v9, %v2434_v10  ;;  %v911_v13 = vmul.f32 %v856_v9, %v2439_v32  ;;  %v942_v37 = vmul.f32 %v856_v9, %v2476_v45  ;;  %v2626_v1 = vld [vmem:[%s2885_s1 + $0x48] sm:$0xff] }
  0xf5   : > { %v924_v41 = vadd.f32 %v908_v55, %v892_v46  ;;  %v955_v48 = vadd.f32 %v939_v2, %v923_v38  ;;  %v2595_v6 = vadd.f32 %v970_v5, %v954_v47  ;;  %v2597_v14 = vadd.f32 %v1001_v59, %v985_v28  ;;  %v860_v35 = vpop.permute.xlu1 %859  ;;  %v858_v31 = vpop.permute.xlu0 %857  ;;  %v2621_v28 = vld [vmem:[%s2885_s1 + $0x20] sm:$0xff] }
  0xf6   : > { %v973_v8 = vmul.f32 %v856_v9, %v2461_v49  ;;  %v2601_v43 = vmul.f32 %v856_v9, %v2512_v53  ;;  %v925_v24 = vadd.f32 %v909_v3, %v893_v39  ;;  %v879_v58 = vmul.f32 %v854_v40, %v2434_v10 }
  0xf7   : > { %v956_v15 = vadd.f32 %v940_v0, %v924_v41  ;;  %v987_v11 = vadd.f32 %v971_v18, %v955_v48  ;;  %v910_v50 = vmul.f32 %v854_v40, %v2439_v32  ;;  %v941_v46 = vmul.f32 %v854_v40, %v2476_v45 }
  0xf8   : > { %v895_v54 = vadd.f32 %v879_v58, %v2471_v34  ;;  %v972_v12 = vmul.f32 %v854_v40, %v2461_v49  ;;  %v1003_v20 = vmul.f32 %v854_v40, %v2512_v53  ;;  %v944_v42 = vmul.f32 %v860_v35, %v2476_v45 }
  0xf9   : > { %v926_v63 = vadd.f32 %v910_v50, %v894_v36  ;;  %v957_v29 = vadd.f32 %v941_v46, %v925_v24  ;;  %v975_v3 = vmul.f32 %v860_v35, %v2461_v49  ;;  %v1006_v10 = vmul.f32 %v860_v35, %v2512_v53  ;;  %v864_v0 = vpop.permute.xlu1 %863  ;;  %v862_v17 = vpop.permute.xlu0 %861 }
  0xfa   : > { %v988_v33 = vadd.f32 %v972_v12, %v956_v15  ;;  %v2612_v18 = vadd.f32 %v1003_v20, %v987_v11  ;;  %v912_v9 = vmul.f32 %v858_v31, %v2439_v32  ;;  %v943_v34 = vmul.f32 %v858_v31, %v2476_v45  ;;  %v2663_v12 = vld [vmem:[%s2885_s1 + $0x70] sm:$0xff] }
  0xfb   : > { %v958_v38 = vadd.f32 %v942_v37, %v926_v63  ;;  %v989_v47 = vadd.f32 %v973_v8, %v957_v29  ;;  %v974_v40 = vmul.f32 %v858_v31, %v2461_v49  ;;  %v1005_v36 = vmul.f32 %v858_v31, %v2512_v53 }
  0xfc   : > { %v1008_v32 = vmul.f32 %v864_v0, %v2512_v53  ;;  %v896_v45 = vadd.f32 %v880_v19, %v2485_v21  ;;  %v927_v55 = vadd.f32 %v911_v13, %v895_v54  ;;  %v976_v2 = vmul.f32 %v862_v17, %v2461_v49 }
  0xfd   : > { %v990_v5 = vadd.f32 %v974_v40, %v958_v38  ;;  %v2631_v59 = vadd.f32 %v1005_v36, %v989_v47  ;;  %v1007_v39 = vmul.f32 %v862_v17, %v2512_v53  ;;  %v1028_v37 = vpop.permute.xlu1 %1027  ;;  %v1010_v41 = vadd.f32 %v2520_v61, %v2538_v23  ;;  %v1026_v48 = vpop.permute.xlu0 %1025  ;;  %v2648_v23 = vld [vmem:[%s2885_s1 + $0x98] sm:$0xff] }
  0xfe   : > { %v928_v35 = vadd.f32 %v912_v9, %v896_v45  ;;  %v959_v31 = vadd.f32 %v943_v34, %v927_v55  ;;  %v1066_v8 = vmul.f32 %v1028_v37, %v2621_v28  ;;  %v1097_v24 = vmul.f32 %v1028_v37, %v2626_v1 }
  0xff   : > { %v2638_v21 = vadd.f32 %v1006_v10, %v990_v5  ;;  %v993_v49 = vmul.f32 %v2490_v4, %v2512_v53  ;;  %v977_v19 = vadd.f32 %v2482_v44, %v2499_v30  ;;  %v1065_v13 = vmul.f32 %v1026_v48, %v2621_v28 }
 0x100   : > { %v960_v58 = vadd.f32 %v944_v42, %v928_v35  ;;  %v991_v15 = vadd.f32 %v975_v3, %v959_v31  ;;  %v1082_v61 = vadd.f32 %v1066_v8, %v1010_v41  ;;  %v1012_v11 = vadd.f32 %v2529_v7, %v2543_v16 }
 0x101   : > { %v1009_v50 = vadd.f32 %v993_v49, %v977_v19  ;;  %v1032_v46 = vpop.permute.xlu1 %1031  ;;  %v979_v4 = vadd.f32 %v2503_v57, %v2525_v27  ;;  %v1014_v44 = vadd.f32 %v2548_v26, %v2559_v22  ;;  %v1016_v30 = vadd.f32 %v2566_v60, %v2577_v56 }
 0x102   : > { %v992_v53 = vadd.f32 %v976_v2, %v960_v58  ;;  %v2658_v54 = vadd.f32 %v1007_v39, %v991_v15  ;;  %v1068_v7 = vmul.f32 %v1032_v46, %v2621_v28  ;;  %v1099_v16 = vmul.f32 %v1032_v46, %v2626_v1  ;;  %v1030_v20 = vpop.permute.xlu0 %1029 }
 0x103   : > { %v1081_v57 = vadd.f32 %v1065_v13, %v1009_v50  ;;  %v1130_v27 = vmul.f32 %v1032_v46, %v2663_v12  ;;  %v1161_v26 = vmul.f32 %v1032_v46, %v2648_v23  ;;  %v1011_v22 = vadd.f32 %v2536_v62, %v979_v4  ;;  %v2683_v62 = vld [vmem:[%s2885_s1 + $0xc0] sm:$0xff] }
 0x104   : > { %v2670_v60 = vadd.f32 %v1008_v32, %v992_v53  ;;  %v1084_v56 = vadd.f32 %v1068_v7, %v1012_v11  ;;  %v1067_v42 = vmul.f32 %v1030_v20, %v2621_v28  ;;  %v1098_v63 = vmul.f32 %v1030_v20, %v2626_v1 }
 0x105   : > { %v1113_v29 = vadd.f32 %v1097_v24, %v1081_v57  ;;  %v1129_v3 = vmul.f32 %v1030_v20, %v2663_v12  ;;  %v1036_v10 = vpop.permute.xlu1 %1035  ;;  %v1018_v0 = vadd.f32 %v2584_v52, %v2595_v6  ;;  %v2678_v17 = vadd.f32 %v2601_v43, %v988_v33  ;;  %v2701_v24 = vld [vmem:[%s2886_s2] sm:$0xff] }
 0x106   : > { %v1083_v9 = vadd.f32 %v1067_v42, %v1011_v22  ;;  %v1114_v34 = vadd.f32 %v1098_v63, %v1082_v61  ;;  %v1070_v38 = vmul.f32 %v1036_v10, %v2621_v28  ;;  %v1101_v47 = vmul.f32 %v1036_v10, %v2626_v1  ;;  %v1034_v40 = vpop.permute.xlu0 %1033 }
 0x107   : > { %v1145_v36 = vadd.f32 %v1129_v3, %v1113_v29  ;;  %v1132_v32 = vmul.f32 %v1036_v10, %v2663_v12  ;;  %v1163_v52 = vmul.f32 %v1036_v10, %v2648_v23  ;;  %v1194_v6 = vmul.f32 %v1036_v10, %v2683_v62 }
 0x108   : > { %v1115_v43 = vadd.f32 %v1099_v16, %v1083_v9  ;;  %v1146_v33 = vadd.f32 %v1130_v27, %v1114_v34  ;;  %v1086_v45 = vadd.f32 %v1070_v38, %v1014_v44  ;;  %v1069_v55 = vmul.f32 %v1034_v40, %v2621_v28 }
 0x109   : > { %v1177_v2 = vadd.f32 %v1161_v26, %v1145_v36  ;;  %v1100_v5 = vmul.f32 %v1034_v40, %v2626_v1  ;;  %v1131_v39 = vmul.f32 %v1034_v40, %v2663_v12  ;;  %v1162_v37 = vmul.f32 %v1034_v40, %v2648_v23  ;;  %v1040_v41 = vpop.permute.xlu1 %1039 }
 0x10a   : > { %v1085_v48 = vadd.f32 %v1069_v55, %v2561_v51  ;;  %v1193_v35 = vmul.f32 %v1034_v40, %v2683_v62  ;;  %v1072_v31 = vmul.f32 %v1040_v41, %v2621_v28  ;;  %v1103_v8 = vmul.f32 %v1040_v41, %v2626_v1  ;;  %v1038_v15 = vpop.permute.xlu0 %1037 }
 0x10b   : > { %v1116_v49 = vadd.f32 %v1100_v5, %v1084_v56  ;;  %v1147_v19 = vadd.f32 %v1131_v39, %v1115_v43  ;;  %v1178_v13 = vadd.f32 %v1162_v37, %v1146_v33  ;;  %v1134_v58 = vmul.f32 %v1040_v41, %v2663_v12 }
 0x10c   : > { %v1209_v61 = vadd.f32 %v1193_v35, %v1177_v2  ;;  %v1088_v11 = vadd.f32 %v1072_v31, %v1016_v30  ;;  %v1165_v51 = vmul.f32 %v1040_v41, %v2648_v23  ;;  %v1196_v50 = vmul.f32 %v1040_v41, %v2683_v62 }
 0x10d   : > { %v1210_v46 = vadd.f32 %v1194_v6, %v1178_v13  ;;  %v1117_v4 = vadd.f32 %v1101_v47, %v1085_v48  ;;  %v1148_v44 = vadd.f32 %v1132_v32, %v1116_v49  ;;  %v1179_v53 = vadd.f32 %v1163_v52, %v1147_v19  ;;  %v1044_v7 = vpop.permute.xlu1 %1043 }
 0x10e   : > { %v2707_v16 = vadd.f32 %v2701_v24, %v1209_v61  ;;  %v1071_v20 = vmul.f32 %v1038_v15, %v2621_v28  ;;  %v1102_v57 = vmul.f32 %v1038_v15, %v2626_v1  ;;  %v1133_v27 = vmul.f32 %v1038_v15, %v2663_v12  ;;  %v1042_v52 = vpop.permute.xlu0 %1041 }
 0x10f   : > { %v2713_v30 = vadd.f32 %v2701_v24, %v1210_v46  ;;  %v1164_v26 = vmul.f32 %v1038_v15, %v2648_v23  ;;  %v1195_v22 = vmul.f32 %v1038_v15, %v2683_v62  ;;  %v1074_v56 = vmul.f32 %v1044_v7, %v2621_v28 }
 0x110   : > { %v1242_v42 = vsub.f32 0.0, %v2707_v16  ;;  %v1087_v63 = vadd.f32 %v1071_v20, %v2579_v25  ;;  %v1118_v29 = vadd.f32 %v1102_v57, %v1086_v45  ;;  %v1149_v3 = vadd.f32 %v1133_v27, %v1117_v4 }
 0x111   : > { %v1243_v10 = vsub.f32 0.0, %v2713_v30  ;;  %v1180_v9 = vadd.f32 %v1164_v26, %v1148_v44  ;;  %v1211_v34 = vadd.f32 %v1195_v22, %v1179_v53  ;;  %v1090_v38 = vadd.f32 %v1074_v56, %v1018_v0  ;;  %v1048_v0 = vpop.permute.xlu1 %1047 }
 0x112   : > { %v1258_v47 = vmul.f32 1.442695, %v1242_v42  ;;  %v1105_v40 = vmul.f32 %v1044_v7, %v2626_v1  ;;  %v1136_v36 = vmul.f32 %v1044_v7, %v2663_v12  ;;  %v1167_v32 = vmul.f32 %v1044_v7, %v2648_v23  ;;  %v1046_v44 = vpop.permute.xlu0 %1045 }
 0x113   : > { %v1260_v6 = vmul.f32 1.442695, %v1243_v10  ;;  %v1212_v43 = vadd.f32 %v1196_v50, %v1180_v9  ;;  %v2725_v33 = vadd.f32 %v2701_v24, %v1211_v34  ;;  %v1198_v25 = vmul.f32 %v1044_v7, %v2683_v62 }
 0x114   : > { %1510 = vpow2.f32 %v1258_v47  ;;  %v1119_v45 = vadd.f32 %v1103_v8, %v1087_v63  ;;  %v1150_v55 = vadd.f32 %v1134_v58, %v1118_v29  ;;  %v1181_v2 = vadd.f32 %v1165_v51, %v1149_v3 }
 0x115   : > { %1512 = vpow2.f32 %v1260_v6  ;;  %v2729_v5 = vadd.f32 %v2701_v24, %v1212_v43  ;;  %v1244_v39 = vsub.f32 0.0, %v2725_v33  ;;  %v1073_v37 = vmul.f32 %v1042_v52, %v2621_v28  ;;  %v1052_v26 = vpop.permute.xlu1 %1051 }
 0x116   : > { %v1104_v41 = vmul.f32 %v1042_v52, %v2626_v1  ;;  %v1135_v48 = vmul.f32 %v1042_v52, %v2663_v12  ;;  %v1166_v35 = vmul.f32 %v1042_v52, %v2648_v23  ;;  %v1197_v31 = vmul.f32 %v1042_v52, %v2683_v62 }
 0x117   : > { %v1245_v8 = vsub.f32 0.0, %v2729_v5  ;;  %v1262_v49 = vmul.f32 1.442695, %v1244_v39  ;;  %v1089_v19 = vadd.f32 %v1073_v37, %v2597_v14  ;;  %v1076_v13 = vmul.f32 %v1048_v0, %v2621_v28 }
 0x118   : > { %v1120_v58 = vadd.f32 %v1104_v41, %v1088_v11  ;;  %v1151_v15 = vadd.f32 %v1135_v48, %v1119_v45  ;;  %v1182_v61 = vadd.f32 %v1166_v35, %v1150_v55  ;;  %v1213_v51 = vadd.f32 %v1197_v31, %v1181_v2 }
 0x119   : > { %1514 = vpow2.f32 %v1262_v49  ;;  %v1264_v50 = vmul.f32 1.442695, %v1245_v8  ;;  %v2741_v46 = vadd.f32 %v1076_v13, %v2678_v17  ;;  %v1107_v4 = vmul.f32 %v1048_v0, %v2626_v1 }
 0x11a   : > { %v1214_v53 = vadd.f32 %v1198_v25, %v1182_v61  ;;  %v2745_v7 = vadd.f32 %v2701_v24, %v1213_v51  ;;  %v1138_v14 = vmul.f32 %v1048_v0, %v2663_v12  ;;  %v1169_v20 = vmul.f32 %v1048_v0, %v2648_v23 }
 0x11b   : > { %1516 = vpow2.f32 %v1264_v50  ;;  %v1200_v11 = vmul.f32 %v1048_v0, %v2683_v62  ;;  %v1121_v57 = vadd.f32 %v1105_v40, %v1089_v19  ;;  %v1152_v27 = vadd.f32 %v1136_v36, %v1120_v58  ;;  %v1050_v0 = vpop.permute.xlu0 %1049 }
 0x11c   : > { %v2751_v17 = vadd.f32 %v2701_v24, %v1214_v53  ;;  %v1246_v22 = vsub.f32 0.0, %v2745_v7  ;;  %v1183_v56 = vadd.f32 %v1167_v32, %v1151_v15  ;;  %v1075_v42 = vmul.f32 %v1046_v44, %v2621_v28  ;;  %v1056_v53 = vpop.permute.xlu1 %1055 }
 0x11d   : > { %v1106_v63 = vmul.f32 %v1046_v44, %v2626_v1  ;;  %v1137_v29 = vmul.f32 %v1046_v44, %v2663_v12  ;;  %v1168_v3 = vmul.f32 %v1046_v44, %v2648_v23  ;;  %v1199_v10 = vmul.f32 %v1046_v44, %v2683_v62 }
 0x11e   : > { %v1511_v9 = vpop.eup %1510  ;;  %v1247_v34 = vsub.f32 0.0, %v2751_v17  ;;  %v1266_v47 = vmul.f32 1.442695, %v1246_v22  ;;  %v1091_v40 = vadd.f32 %v1075_v42, %v2612_v18  ;;  %v1078_v36 = vmul.f32 %v1052_v26, %v2621_v28 }
 0x11f   : > { %v1513_v52 = vpop.eup %1512  ;;  %v1290_v32 = vadd.f32 1.0, %v1511_v9  ;;  %v1122_v6 = vadd.f32 %v1106_v63, %v1090_v38  ;;  %v1153_v43 = vadd.f32 %v1137_v29, %v1121_v57  ;;  %v1184_v25 = vadd.f32 %v1168_v3, %v1152_v27  ;;  %v1054_v27 = vpop.permute.xlu0 %1053 }
 0x120   : > { %v1291_v45 = vadd.f32 1.0, %v1513_v52  ;;  %1518 = vpow2.f32 %v1266_v47  ;;  %v1268_v55 = vmul.f32 1.442695, %v1247_v34  ;;  %v1215_v2 = vadd.f32 %v1199_v10, %v1183_v56 }
 0x121   : > { %1520 = vrcp.f32 %v1290_v32  ;;  %v1216_v39 = vadd.f32 %v1200_v11, %v1184_v25  ;;  %v2763_v37 = vadd.f32 %v1078_v36, %v2638_v21  ;;  %v1109_v41 = vmul.f32 %v1052_v26, %v2626_v1 }
 0x122   : > { %1522 = vrcp.f32 %v1291_v45  ;;  %v2767_v18 = vadd.f32 %v2701_v24, %v1215_v2  ;;  %v1140_v38 = vmul.f32 %v1052_v26, %v2663_v12  ;;  %v1171_v48 = vmul.f32 %v1052_v26, %v2648_v23 }
 0x123   : > { %v1515_v35 = vpop.eup %1514  ;;  %1524 = vpow2.f32 %v1268_v55  ;;  %v2772_v31 = vadd.f32 %v2701_v24, %v1216_v39  ;;  %v1202_v8 = vmul.f32 %v1052_v26, %v2683_v62  ;;  %v1123_v49 = vadd.f32 %v1107_v4, %v1091_v40  ;;  %v1058_v2 = vpop.permute.xlu0 %1057 }
 0x124   : > { %v1292_v21 = vadd.f32 1.0, %v1515_v35  ;;  %v1248_v19 = vsub.f32 0.0, %v2767_v18  ;;  %v1154_v13 = vadd.f32 %v1138_v14, %v1122_v6  ;;  %v1185_v58 = vadd.f32 %v1169_v20, %v1153_v43 }
 0x125   : > { %v1517_v15 = vpop.eup %1516  ;;  %v1249_v61 = vsub.f32 0.0, %v2772_v31  ;;  %v1077_v51 = vmul.f32 %v1050_v0, %v2621_v28  ;;  %v1108_v50 = vmul.f32 %v1050_v0, %v2626_v1  ;;  %v1139_v44 = vmul.f32 %v1050_v0, %v2663_v12 }
 0x126   : > { %v1293_v11 = vadd.f32 1.0, %v1517_v15  ;;  %1526 = vrcp.f32 %v1292_v21  ;;  %v1270_v57 = vmul.f32 1.442695, %v1248_v19  ;;  %v1170_v4 = vmul.f32 %v1050_v0, %v2648_v23 }
 0x127   : > { %v1272_v26 = vmul.f32 1.442695, %v1249_v61  ;;  %v1093_v14 = vadd.f32 %v1077_v51, %v2631_v59  ;;  %v1124_v20 = vadd.f32 %v1108_v50, %v2741_v46  ;;  %v1155_v22 = vadd.f32 %v1139_v44, %v1123_v49  ;;  %v1060_v61 = vpop.permute.xlu1 %1059 }
 0x128   : > { %1528 = vrcp.f32 %v1293_v11  ;;  %v1186_v56 = vadd.f32 %v1170_v4, %v1154_v13  ;;  %v1201_v42 = vmul.f32 %v1050_v0, %v2683_v62  ;;  %v2786_v63 = vmul.f32 %v1056_v53, %v2621_v28 }
 0x129   : > { %1530 = vpow2.f32 %v1270_v57  ;;  %v2789_v29 = vmul.f32 %v1056_v53, %v2626_v1  ;;  %v1142_v3 = vmul.f32 %v1056_v53, %v2663_v12  ;;  %v1173_v10 = vmul.f32 %v1056_v53, %v2648_v23 }
 0x12a   : > { %v1519_v59 = vpop.eup %1518  ;;  %1532 = vpow2.f32 %v1272_v26  ;;  %v1217_v46 = vadd.f32 %v1201_v42, %v1185_v58  ;;  %v1218_v9 = vadd.f32 %v1202_v8, %v1186_v56  ;;  %v1204_v34 = vmul.f32 %v1056_v53, %v2683_v62 }
 0x12b   : > { %v1521_v47 = vpop.eup %1520  ;;  %v1294_v40 = vadd.f32 1.0, %v1519_v59  ;;  %v1125_v36 = vadd.f32 %v1109_v41, %v1093_v14  ;;  %v1156_v52 = vadd.f32 %v1140_v38, %v1124_v20  ;;  %v1187_v32 = vadd.f32 %v1171_v48, %v1155_v22 }
 0x12c   : > { %v1523_v6 = vpop.eup %1522  ;;  %v1322_v43 = vmul.f32 %v1521_v47, %v2707_v16  ;;  %v2801_v25 = vadd.f32 %v2701_v24, %v1217_v46  ;;  %v2804_v45 = vadd.f32 %v2701_v24, %v1218_v9  ;;  %v1079_v55 = vmul.f32 %v1054_v27, %v2621_v28  ;;  %v1062_v47 = vpop.permute.xlu0 %1061 }
 0x12d   : > { %v1525_v0 = vpop.eup %1524  ;;  %v1323_v39 = vmul.f32 %v1523_v6, %v2713_v30  ;;  %1534 = vrcp.f32 %v1294_v40  ;;  %v1110_v41 = vmul.f32 %v1054_v27, %v2626_v1  ;;  %v1141_v38 = vmul.f32 %v1054_v27, %v2663_v12 }
 0x12e   : > { %1338 = vst [vmem:[%s2797_s5] sm:$0xff] %v1322_v43  ;;  %v1295_v48 = vadd.f32 1.0, %v1525_v0  ;;  %v1250_v16 = vsub.f32 0.0, %v2801_v25  ;;  %v1251_v35 = vsub.f32 0.0, %v2804_v45  ;;  %v1172_v8 = vmul.f32 %v1054_v27, %v2648_v23  ;;  %v1064_v0 = vpop.permute.xlu1 %1063 }
 0x12f   : > { %1339 = vst [vmem:[%s2797_s5 + $0x8] sm:$0xff] %v1323_v39  ;;  %v1126_v28 = vadd.f32 %v1110_v41, %v2763_v37  ;;  %v1157_v49 = vadd.f32 %v1141_v38, %v1125_v36  ;;  %v1203_v21 = vmul.f32 %v1054_v27, %v2683_v62  ;;  %v1112_v30 = vmul.f32 %v1058_v2, %v2626_v1 }
 0x130   : > { %v1527_v19 = vpop.eup %1526  ;;  %1536 = vrcp.f32 %v1295_v48  ;;  %v1274_v13 = vmul.f32 1.442695, %v1250_v16  ;;  %v1276_v58 = vmul.f32 1.442695, %v1251_v35  ;;  %v1188_v15 = vadd.f32 %v1172_v8, %v1156_v52 }
 0x131   : > { %v1324_v51 = vmul.f32 %v1527_v19, %v2725_v33  ;;  %v1219_v50 = vadd.f32 %v1203_v21, %v1187_v32  ;;  %v1189_v44 = vadd.f32 %v1173_v10, %v1157_v49  ;;  %v1143_v53 = vmul.f32 %v1058_v2, %v2663_v12 }
 0x132   : > { %v1529_v11 = vpop.eup %1528  ;;  %1538 = vpow2.f32 %v1274_v13  ;;  %v1220_v37 = vadd.f32 %v1204_v34, %v1188_v15  ;;  %v1174_v57 = vmul.f32 %v1058_v2, %v2648_v23  ;;  %v1205_v1 = vmul.f32 %v1058_v2, %v2683_v62 }
 0x133   : > { %v1531_v4 = vpop.eup %1530  ;;  %v1325_v27 = vmul.f32 %v1529_v11, %v2729_v5  ;;  %1340 = vst [vmem:[%s2797_s5 + $0x10] sm:$0xff] %v1324_v51  ;;  %1540 = vpow2.f32 %v1276_v58  ;;  %v2825_v26 = vadd.f32 %v2701_v24, %v1219_v50  ;;  %v1144_v33 = vmul.f32 %v1060_v61, %v2663_v12 }
 0x134   : > { %v1533_v14 = vpop.eup %1532  ;;  %v1296_v20 = vadd.f32 1.0, %v1531_v4  ;;  %v2829_v22 = vadd.f32 %v2701_v24, %v1220_v37  ;;  %v1221_v56 = vadd.f32 %v1205_v1, %v1189_v44  ;;  %v1158_v42 = vadd.f32 %v1142_v3, %v1126_v28 }
 0x135   : > { %1341 = vst [vmem:[%s2797_s5 + $0x18] sm:$0xff] %v1325_v27  ;;  %v1297_v10 = vadd.f32 1.0, %v1533_v14  ;;  %v1252_v59 = vsub.f32 0.0, %v2825_v26  ;;  %v1175_v5 = vmul.f32 %v1060_v61, %v2648_v23  ;;  %v1206_v46 = vmul.f32 %v1060_v61, %v2683_v62 }
 0x136   : > { %1542 = vrcp.f32 %v1296_v20  ;;  %v1253_v9 = vsub.f32 0.0, %v2829_v22  ;;  %v2837_v12 = vadd.f32 %v2701_v24, %v1221_v56  ;;  %v1190_v34 = vadd.f32 %v1174_v57, %v1158_v42 }
 0x137   : > { %v1535_v40 = vpop.eup %1534  ;;  %1544 = vrcp.f32 %v1297_v10  ;;  %v1278_v3 = vmul.f32 1.442695, %v1252_v59  ;;  %v1095_v36 = vadd.f32 %v1079_v55, %v2658_v54  ;;  %v1096_v52 = vadd.f32 %v2786_v63, %v2670_v60 }
 0x138   : > { %v1326_v32 = vmul.f32 %v1535_v40, %v2745_v7  ;;  %v1280_v6 = vmul.f32 1.442695, %v1253_v9  ;;  %v1254_v43 = vsub.f32 0.0, %v2837_v12  ;;  %v1222_v2 = vadd.f32 %v1206_v46, %v1190_v34 }
 0x139   : > { %1546 = vpow2.f32 %v1278_v3  ;;  %v1127_v39 = vadd.f32 %v2789_v29, %v1095_v36  ;;  %v1128_v41 = vadd.f32 %v1112_v30, %v1096_v52  ;;  %v1176_v38 = vmul.f32 %v1062_v47, %v2648_v23 }
 0x13a   : > { %v1537_v48 = vpop.eup %1536  ;;  %1342 = vst [vmem:[%s2797_s5 + $0x20] sm:$0xff] %v1326_v32  ;;  %1548 = vpow2.f32 %v1280_v6  ;;  %v1282_v54 = vmul.f32 1.442695, %v1254_v43  ;;  %v2848_v60 = vadd.f32 %v2701_v24, %v1222_v2  ;;  %v1207_v7 = vmul.f32 %v1062_v47, %v2683_v62 }
 0x13b   : > { %v1327_v63 = vmul.f32 %v1537_v48, %v2751_v17  ;;  %v1159_v55 = vadd.f32 %v1143_v53, %v1127_v39  ;;  %v1160_v16 = vadd.f32 %v1144_v33, %v1128_v41  ;;  %v1208_v35 = vmul.f32 %v1064_v0, %v2683_v62 }
 0x13c   : > { %v1539_v29 = vpop.eup %1538  ;;  %1550 = vpow2.f32 %v1282_v54  ;;  %v1255_v8 = vsub.f32 0.0, %v2848_v60 }
 0x13d   : > { %v1541_v23 = vpop.eup %1540  ;;  %1343 = vst [vmem:[%s2797_s5 + $0x28] sm:$0xff] %v1327_v63  ;;  %v1298_v28 = vadd.f32 1.0, %v1539_v29  ;;  %v1191_v49 = vadd.f32 %v1175_v5, %v1159_v55  ;;  %v1192_v21 = vadd.f32 %v1176_v38, %v1160_v16 }
 0x13e   : > { %v1299_v30 = vadd.f32 1.0, %v1541_v23  ;;  %v1284_v19 = vmul.f32 1.442695, %v1255_v8 }
 0x13f   : > { %1552 = vrcp.f32 %v1298_v28  ;;  %v1223_v13 = vadd.f32 %v1207_v7, %v1191_v49  ;;  %v1224_v17 = vadd.f32 %v1208_v35, %v1192_v21 }
 0x140   : > { %v1543_v58 = vpop.eup %1542  ;;  %1554 = vrcp.f32 %v1299_v30 }
 0x141   : > { %v1545_v15 = vpop.eup %1544  ;;  %v1328_v62 = vmul.f32 %v1543_v58, %v2767_v18  ;;  %1556 = vpow2.f32 %v1284_v19  ;;  %v1240_v61 = vadd.f32 %v2701_v24, %v1223_v13  ;;  %v1241_v51 = vadd.f32 %v2701_v24, %v1224_v17 }
 0x142   : > { %v1329_v50 = vmul.f32 %v1545_v15, %v2772_v31 }
 0x143   : > { %v1547_v44 = vpop.eup %1546  ;;  %1344 = vst [vmem:[%s2797_s5 + $0x30] sm:$0xff] %v1328_v62  ;;  %v1256_v53 = vsub.f32 0.0, %v1240_v61  ;;  %v1257_v11 = vsub.f32 0.0, %v1241_v51 }
 0x144   : > { %v1549_v37 = vpop.eup %1548  ;;  %1345 = vst [vmem:[%s2797_s5 + $0x38] sm:$0xff] %v1329_v50  ;;  %v1300_v57 = vadd.f32 1.0, %v1547_v44 }
 0x145   : > { %v1301_v1 = vadd.f32 1.0, %v1549_v37  ;;  %v1286_v4 = vmul.f32 1.442695, %v1256_v53  ;;  %v1288_v18 = vmul.f32 1.442695, %v1257_v11 }
 0x146   : > { %v1551_v27 = vpop.eup %1550  ;;  %1558 = vrcp.f32 %v1300_v57 }
 0x147   : > { %1560 = vrcp.f32 %v1301_v1  ;;  %v1302_v33 = vadd.f32 1.0, %v1551_v27 }
 0x148   : > { %1562 = vpow2.f32 %v1286_v4 }
 0x149   : > { %v1553_v24 = vpop.eup %1552  ;;  %1564 = vrcp.f32 %v1302_v33 }
 0x14a   : > { %v1555_v31 = vpop.eup %1554  ;;  %v1330_v14 = vmul.f32 %v1553_v24, %v2801_v25  ;;  %1566 = vpow2.f32 %v1288_v18 }
 0x14b   : > { %v1557_v20 = vpop.eup %1556  ;;  %v1331_v56 = vmul.f32 %v1555_v31, %v2804_v45 }
 0x14c   : > { %1346 = vst [vmem:[%s2797_s5 + $0x40] sm:$0xff] %v1330_v14  ;;  %v1303_v42 = vadd.f32 1.0, %v1557_v20 }
 0x14d   : > { %1347 = vst [vmem:[%s2797_s5 + $0x48] sm:$0xff] %v1331_v56 }
 0x14e   : > { %1568 = vrcp.f32 %v1303_v42 }
 0x150   : > { %v1559_v10 = vpop.eup %1558 }
 0x151   : > { %v1561_v59 = vpop.eup %1560  ;;  %v1332_v5 = vmul.f32 %v1559_v10, %v2825_v26 }
 0x152   : > { %v1563_v46 = vpop.eup %1562  ;;  %v1333_v9 = vmul.f32 %v1561_v59, %v2829_v22 }
 0x153   : > { %v1565_v34 = vpop.eup %1564  ;;  %1348 = vst [vmem:[%s2797_s5 + $0x50] sm:$0xff] %v1332_v5  ;;  %v1304_v25 = vadd.f32 1.0, %v1563_v46 }
 0x154   : > { %v1567_v47 = vpop.eup %1566  ;;  %1349 = vst [vmem:[%s2797_s5 + $0x58] sm:$0xff] %v1333_v9  ;;  %v1334_v45 = vmul.f32 %v1565_v34, %v2837_v12 }
 0x155   : > { %1570 = vrcp.f32 %v1304_v25  ;;  %v1305_v40 = vadd.f32 1.0, %v1567_v47 }
 0x156   : > { %1350 = vst [vmem:[%s2797_s5 + $0x60] sm:$0xff] %v1334_v45 }
 0x157   : > { %1572 = vrcp.f32 %v1305_v40 }
 0x158   : > { %v1569_v3 = vpop.eup %1568 }
 0x159   : > { %v1335_v36 = vmul.f32 %v1569_v3, %v2848_v60 }
 0x15b   : > { %1351 = vst [vmem:[%s2797_s5 + $0x68] sm:$0xff] %v1335_v36 }
 0x15f   : > { %v1571_v26 = vpop.eup %1570 }
 0x160   : > { %v1336_v52 = vmul.f32 %v1571_v26, %v1240_v61 }
 0x161   : > { %v1573_v22 = vpop.eup %1572 }
 0x162   : > { %1352 = vst [vmem:[%s2797_s5 + $0x70] sm:$0xff] %v1336_v52  ;;  %v1337_v32 = vmul.f32 %v1573_v22, %v1241_v51 }
 0x164   : > { %1353 = vst [vmem:[%s2797_s5 + $0x78] sm:$0xff] %v1337_v32 }
 0x165 PF: > { %s13_s14 = sadd.s32 1, %s1596_s14   ;;  %s2888_s12 = smov %s1592_s13 }
 0x166   : > { %p10_p5 = scmp.ge.s32.totalorder %s13_s14, 4   ;;  %s2889_s13 = smov %s2891_s15 }
 0x168   :  { %12 = sbr.rel (!%p10_p5) target bundleno = 2 (0x2), region = 68 }

</bundles_post_ra>
